<compile_context>
chip_gen: v6e
topology: v6e:2x2x1
jax: 0.10.0
libtpu: 0.0.40
codegen_flags: <defaults>
</compile_context>

<pallas_src>
import functools

import numpy as np
import jax
import jax.numpy as jnp
from jax import lax
from jax.experimental import pallas as pl
from jax.experimental.pallas import tpu as pltpu

MXU_DTYPE = jnp.bfloat16   # MXU operands in bf16; f32 accumulation + epilogues
LN_EPS = 1e-5              # torch.nn.LayerNorm default eps
QK_EPS = 1e-6              # SGFormerAttention epsilon for exact-zero q/k entries


def _round_up(v, m):
    return ((v + m - 1) // m) * m


def _layernorm(x, gamma, beta, eps=LN_EPS):
    mean = jnp.mean(x, axis=-1, keepdims=True)
    var = jnp.mean(jnp.square(x - mean), axis=-1, keepdims=True)
    return (x - mean) * lax.rsqrt(var + eps) * gamma + beta


# --------------------------- fused SGModule kernel ---------------------------

def _sg_module_kernel(counts_ref, x_ref, fcw_ref, fcb_ref, lng_ref, lnb_ref,
                      wqkv_ref, o_ref, *, n_dense, num_layers):
    """Whole SGModule forward (eval) on the dense node batch, in one invocation.

    Layout: rows are the flattened dense batch, graph b occupies rows
    [b*Np, (b+1)*Np) with Np a multiple of 8; positions >= n_dense are pure
    TPU alignment padding and are excluded from the q/k norms and sum(k).
    """
    B = counts_ref.shape[0]
    M, _ = x_ref.shape
    Np = M // B
    H = fcw_ref.shape[1]

    # ---- fc -> LayerNorm -> ReLU (dropout = identity in eval) ----
    lng = lng_ref[...]                       # (L+1, H)
    lnb = lnb_ref[...]
    h = jnp.dot(x_ref[...].astype(MXU_DTYPE), fcw_ref[...].astype(MXU_DTYPE),
                preferred_element_type=jnp.float32) + fcb_ref[...]
    h = jnp.maximum(_layernorm(h, lng[0:1, :], lnb[0:1, :]), 0.0)

    # per-graph valid-node masks built in-kernel from SMEM counts
    node_iota = lax.broadcasted_iota(jnp.int32, (Np, 1), 0)
    graph_mask = [(node_iota < counts_ref[b]).astype(jnp.float32) for b in range(B)]
    # rows that exist in the torch dense batch (position < n_dense)
    in_dense = (node_iota < n_dense).astype(jnp.float32)            # (Np, 1)

    wqkv = wqkv_ref[...]                     # (L, H, 3H)

    for i in range(num_layers):
        prev = h
        # single fused QKV projection: one (H, 3H) MXU pass over h
        qkv = jnp.dot(h.astype(MXU_DTYPE), wqkv[i].astype(MXU_DTYPE),
                      preferred_element_type=jnp.float32)            # (M, 3H)
        q = qkv[:, :H]
        k = qkv[:, H:2 * H]
        v = qkv[:, 2 * H:]
        # qs[qs == 0] = eps ; ks[ks == 0] = eps  (applied to all dense rows)
        q = jnp.where(q == 0.0, QK_EPS, q)
        k = jnp.where(k == 0.0, QK_EPS, k)

        # global Frobenius norms over the whole dense batch (alignment-padding
        # rows excluded); folded into a single scalar 1/(||q|| * ||k||).
        ssq_q = jnp.float32(0.0)
        ssq_k = jnp.float32(0.0)
        for b in range(B):
            qb = q[b * Np:(b + 1) * Np]
            kb = k[b * Np:(b + 1) * Np]
            ssq_q = ssq_q + jnp.sum(jnp.square(qb * in_dense))
            ssq_k = ssq_k + jnp.sum(jnp.square(kb * in_dense))
        scale = lax.rsqrt(ssq_q * ssq_k)

        outs = []
        for b in range(B):                   # static unroll; aligned row slices
            qb = q[b * Np:(b + 1) * Np]                               # (Np, H)
            kb = k[b * Np:(b + 1) * Np]
            vb = v[b * Np:(b + 1) * Np] * graph_mask[b]               # mask V only
            kvs = lax.dot_general(kb.astype(MXU_DTYPE), vb.astype(MXU_DTYPE),
                                  (((0,), (0,)), ((), ())),
                                  preferred_element_type=jnp.float32)  # (H, H)
            num = jnp.dot(qb.astype(MXU_DTYPE), kvs.astype(MXU_DTYPE),
                          preferred_element_type=jnp.float32) * scale + n_dense * vb
            ks_sum = jnp.sum(kb * in_dense, axis=0, keepdims=True)     # (1, H)
            den = jnp.sum(qb * ks_sum, axis=-1, keepdims=True) * scale + n_dense
            outs.append(num / den)           # exact divide (bit-parity friendlier)
        attn = jnp.concatenate(outs, axis=0)                          # (M, H)

        # (attn + previous layer)/2 -> LayerNorm -> ReLU, fused epilogue
        y = (attn + prev) * 0.5
        h = jnp.maximum(_layernorm(y, lng[i + 1:i + 2, :], lnb[i + 1:i + 2, :]), 0.0)

    o_ref[...] = h


# ------------------------------ JAX-side glue --------------------------------

def _dense_batch(x, batch, num_graphs, n_pad):
    """to_dense_batch glue (stable sort + scatter).
    TODO(synk): data-dependent scatter/gather has no clean BlockSpec form; it
    stays in plain JAX/XLA."""
    N = x.shape[0]
    indices = jnp.argsort(batch, stable=True)
    sorted_batch = batch[indices]
    rev_perm = jnp.argsort(indices, stable=True)        # inverse permutation
    x_sorted = x[indices]
    counts = jnp.zeros((num_graphs,), jnp.int32).at[sorted_batch].add(1)
    starts = jnp.concatenate([jnp.zeros((1,), jnp.int32), jnp.cumsum(counts)[:-1]])
    pos = jnp.arange(N, dtype=jnp.int32) - starts[sorted_batch]
    flat_idx = sorted_batch * n_pad + pos
    dense = jnp.zeros((num_graphs * n_pad, x.shape[1]), jnp.float32).at[flat_idx].set(x_sorted)
    return dense, counts, flat_idx, rev_perm


def sg_module_forward(params, x, batch, num_graphs, n_max, num_layers=2):
    """SGModule.forward (eval mode)."""
    F = x.shape[1]
    H = params['fc_w'].shape[1]
    L = num_layers
    n_pad = max(_round_up(n_max, 8), 8)                  # sublane-aligned stride
    dense, counts, flat_idx, rev_perm = _dense_batch(x, batch, num_graphs, n_pad)
    M = num_graphs * n_pad

    kernel = functools.partial(_sg_module_kernel, n_dense=n_max, num_layers=L)
    out = pl.pallas_call(
        kernel,
        out_shape=jax.ShapeDtypeStruct((M, H), jnp.float32),
        grid=(1,),
        in_specs=[
            pl.BlockSpec(memory_space=pltpu.MemorySpace.SMEM),       # counts (B,)
            pl.BlockSpec((M, F), lambda i: (0, 0)),                  # dense nodes
            pl.BlockSpec((F, H), lambda i: (0, 0)),                  # fc weight
            pl.BlockSpec((1, H), lambda i: (0, 0)),                  # fc bias
            pl.BlockSpec((L + 1, H), lambda i: (0, 0)),              # LN gammas
            pl.BlockSpec((L + 1, H), lambda i: (0, 0)),              # LN betas
            pl.BlockSpec((L, H, 3 * H), lambda i: (0, 0, 0)),        # Q|K|V weights
        ],
        out_specs=pl.BlockSpec((M, H), lambda i: (0, 0)),
        compiler_params=pltpu.CompilerParams(dimension_semantics=("arbitrary",)),
    )(counts, dense, params['fc_w'], params['fc_b'],
      params['ln_g'], params['ln_b'], params['wqkv'])

    return out[flat_idx][rev_perm]


# ------------------------- plain-JAX reference (f32) -------------------------

def sg_module_reference(params, x, batch, num_graphs, n_max, num_layers=2):
    """Pure-JAX mirror of the torch SGModule eval forward (validation only)."""
    N, _ = x.shape
    H = params['fc_w'].shape[1]
    indices = jnp.argsort(batch, stable=True)
    sorted_batch = batch[indices]
    rev_perm = jnp.argsort(indices, stable=True)
    x_sorted = x[indices]
    counts = jnp.zeros((num_graphs,), jnp.int32).at[sorted_batch].add(1)
    starts = jnp.concatenate([jnp.zeros((1,), jnp.int32), jnp.cumsum(counts)[:-1]])
    pos = jnp.arange(N, dtype=jnp.int32) - starts[sorted_batch]
    dense = jnp.zeros((num_graphs, n_max, x.shape[1]), jnp.float32).at[sorted_batch, pos].set(x_sorted)
    mask = (jnp.arange(n_max)[None, :] < counts[:, None]).astype(jnp.float32)[..., None]

    h = dense @ params['fc_w'] + params['fc_b'][0]
    h = jnp.maximum(_layernorm(h, params['ln_g'][0], params['ln_b'][0]), 0.0)
    for i in range(num_layers):
        w = params['wqkv'][i]
        q = h @ w[:, :H]
        k = h @ w[:, H:2 * H]
        v = (h @ w[:, 2 * H:]) * mask
        q = jnp.where(q == 0.0, QK_EPS, q)
        k = jnp.where(k == 0.0, QK_EPS, k)
        q = q / jnp.sqrt(jnp.sum(q * q))
        k = k / jnp.sqrt(jnp.sum(k * k))
        kvs = jnp.einsum('bnm,bnd->bmd', k, v)
        num = jnp.einsum('bnm,bmd->bnd', q, kvs) + n_max * v
        ks_sum = jnp.sum(k, axis=1)
        den = jnp.einsum('bnm,bm->bn', q, ks_sum)[..., None] + n_max
        attn = num / den
        h = jnp.maximum(_layernorm((attn + h) * 0.5,
                                   params['ln_g'][i + 1], params['ln_b'][i + 1]), 0.0)
    return h[sorted_batch, pos][rev_perm]


# --------------------------------- params ------------------------------------

def init_params(key, in_c, hid, num_layers=2):
    ks = jax.random.split(key, 4 + 3 * num_layers)

    def lin_w(k, fin, fout):
        return jax.random.normal(k, (fin, fout), jnp.float32) / np.sqrt(fin)

    wqkv = jnp.stack([
        jnp.concatenate([lin_w(ks[4 + 3 * i + j], hid, hid) for j in range(3)], axis=1)
        for i in range(num_layers)])
    return {
        'fc_w': lin_w(ks[0], in_c, hid),
        'fc_b': 0.05 * jax.random.normal(ks[1], (1, hid), jnp.float32),
        'ln_g': 1.0 + 0.05 * jax.random.normal(ks[2], (num_layers + 1, hid), jnp.float32),
        'ln_b': 0.05 * jax.random.normal(ks[3], (num_layers + 1, hid), jnp.float32),
        'wqkv': wqkv,                                    # (L, H, 3H), no qkv bias
    }


# ----------------------------------- main -------------------------------------

if __name__ == "__main__":
    in_channels, hidden_channels, num_layers = 16, 32, 2

    key = jax.random.PRNGKey(0)
    kx, kp = jax.random.split(key, 2)

    # 2 graphs with 14 and 10 nodes, interleaved so the stable sort / inverse
    # permutation and the dense-batch padding/mask paths are exercised.
    batch_np = np.array(([0, 1] * 10) + [0] * 4, dtype=np.int32)
    N = batch_np.shape[0]                       # 24 nodes
    num_graphs = int(batch_np.max()) + 1        # 2
    n_max = int(np.bincount(batch_np).max())    # 14
    batch = jnp.asarray(batch_np)

    x = jax.random.normal(kx, (N, in_channels), jnp.float32)
    params = init_params(kp, in_channels, hidden_channels, num_layers)

    fwd = jax.jit(sg_module_forward, static_argnums=(3, 4, 5))
    out = jax.block_until_ready(fwd(params, x, batch, num_graphs, n_max, num_layers))

    assert out.shape == (N, hidden_channels)
    assert bool(jnp.all(jnp.isfinite(out)))

    # validate against the plain-JAX (f32) reference of the torch module
    ref = sg_module_reference(params, x, batch, num_graphs, n_max, num_layers)
    max_err = float(jnp.max(jnp.abs(out - ref)))
    assert max_err < 0.25, f"kernel/reference mismatch: max|diff|={max_err}"
    print("KERNEL_OK")
</pallas_src>

<mosaic_0001>
module attributes {stable_mosaic.version = 11 : i64} {
  func.func private @main(%arg0: i32) attributes {dimension_semantics = [#tpu.dimension_semantics<core_parallel>], iteration_bounds = array<i64: 2>, tpu.core_type = #tpu.core_type<sc_scalar_subcore>, window_params = []} {
    return
  }
}

module attributes {stable_mosaic.version = 11 : i64} {
  func.func private @main(%arg0: i32) attributes {dimension_semantics = [#tpu.dimension_semantics<core_parallel>], iteration_bounds = array<i64: 2>, tpu.core_type = #tpu.core_type<sc_scalar_subcore>, window_params = []} {
    return
  }
}

module attributes {stable_mosaic.version = 11 : i64} {
  func.func @_sg_module_kernel(%arg0: i32, %arg1: memref<2xi32, #tpu.memory_space<smem>>, %arg2: memref<32x16xf32, #tpu.memory_space<vmem>>, %arg3: memref<16x32xf32, #tpu.memory_space<vmem>>, %arg4: memref<1x32xf32, #tpu.memory_space<vmem>>, %arg5: memref<3x32xf32, #tpu.memory_space<vmem>>, %arg6: memref<3x32xf32, #tpu.memory_space<vmem>>, %arg7: memref<2x32x96xf32, #tpu.memory_space<vmem>>, %arg8: memref<32x32xf32, #tpu.memory_space<vmem>>) attributes {dimension_semantics = [#tpu.dimension_semantics<arbitrary>], iteration_bounds = array<i64: 1>, scalar_prefetch = 0 : i64, scratch_operands = 0 : i64, tpu.core_type = #tpu.core_type<tc>, window_params = [{transform_indices = @transform_0, window_bounds = array<i64: 2>}, {pipeline_mode = #tpu.pipeline_mode<synchronous>, transform_indices = @transform_1, window_bounds = array<i64: 32, 16>}, {pipeline_mode = #tpu.pipeline_mode<synchronous>, transform_indices = @transform_2, window_bounds = array<i64: 16, 32>}, {pipeline_mode = #tpu.pipeline_mode<synchronous>, transform_indices = @transform_3, window_bounds = array<i64: 1, 32>}, {pipeline_mode = #tpu.pipeline_mode<synchronous>, transform_indices = @transform_4, window_bounds = array<i64: 3, 32>}, {pipeline_mode = #tpu.pipeline_mode<synchronous>, transform_indices = @transform_5, window_bounds = array<i64: 3, 32>}, {pipeline_mode = #tpu.pipeline_mode<synchronous>, transform_indices = @transform_6, window_bounds = array<i64: 2, 32, 96>}, {pipeline_mode = #tpu.pipeline_mode<synchronous>, transform_indices = @transform_7, window_bounds = array<i64: 32, 32>}]} {
    %c0 = arith.constant 0 : index
    %c0_0 = arith.constant 0 : index
    %0 = vector.load %arg5[%c0, %c0_0] : memref<3x32xf32, #tpu.memory_space<vmem>>, vector<3x32xf32>
    %c0_1 = arith.constant 0 : index
    %c0_2 = arith.constant 0 : index
    %1 = vector.load %arg6[%c0_1, %c0_2] : memref<3x32xf32, #tpu.memory_space<vmem>>, vector<3x32xf32>
    %c0_3 = arith.constant 0 : index
    %c0_4 = arith.constant 0 : index
    %2 = vector.load %arg2[%c0_3, %c0_4] : memref<32x16xf32, #tpu.memory_space<vmem>>, vector<32x16xf32>
    %3 = arith.truncf %2 : vector<32x16xf32> to vector<32x16xbf16>
    %c0_5 = arith.constant 0 : index
    %c0_6 = arith.constant 0 : index
    %4 = vector.load %arg3[%c0_5, %c0_6] : memref<16x32xf32, #tpu.memory_space<vmem>>, vector<16x32xf32>
    %5 = arith.truncf %4 : vector<16x32xf32> to vector<16x32xbf16>
    %cst = arith.constant dense<0.000000e+00> : vector<32x32xf32>
    %6 = tpu.matmul %3, %5, %cst {dimension_numbers = #tpu.dot_dimension_numbers<[1], [0], [0], [1], [0, 0, 1, 1], [], []>} : vector<32x16xbf16>, vector<16x32xbf16>, vector<32x32xf32> -> vector<32x32xf32>
    %c0_7 = arith.constant 0 : index
    %c0_8 = arith.constant 0 : index
    %7 = vector.load %arg4[%c0_7, %c0_8] : memref<1x32xf32, #tpu.memory_space<vmem>>, vector<1x32xf32>
    %8 = vector.broadcast %7 : vector<1x32xf32> to vector<32x32xf32>
    %9 = arith.addf %6, %8 : vector<32x32xf32>
    %10 = vector.extract_strided_slice %0 {offsets = [0, 0], sizes = [1, 32], strides = [1, 1]} : vector<3x32xf32> to vector<1x32xf32>
    %11 = vector.extract_strided_slice %1 {offsets = [0, 0], sizes = [1, 32], strides = [1, 1]} : vector<3x32xf32> to vector<1x32xf32>
    %cst_9 = arith.constant dense<0.000000e+00> : vector<32xf32>
    %12 = vector.multi_reduction <add>, %9, %cst_9 [1] : vector<32x32xf32> to vector<32xf32>
    %13 = vector.shape_cast %12 : vector<32xf32> to vector<32x1xf32>
    %cst_10 = arith.constant 3.200000e+01 : f32
    %14 = vector.broadcast %cst_10 : f32 to vector<32x1xf32>
    %15 = arith.divf %13, %14 : vector<32x1xf32>
    %16 = vector.broadcast %15 : vector<32x1xf32> to vector<32x32xf32>
    %17 = arith.subf %9, %16 : vector<32x32xf32>
    %18 = arith.mulf %17, %17 : vector<32x32xf32>
    %cst_11 = arith.constant dense<0.000000e+00> : vector<32xf32>
    %19 = vector.multi_reduction <add>, %18, %cst_11 [1] : vector<32x32xf32> to vector<32xf32>
    %20 = vector.shape_cast %19 : vector<32xf32> to vector<32x1xf32>
    %cst_12 = arith.constant 3.200000e+01 : f32
    %21 = vector.broadcast %cst_12 : f32 to vector<32x1xf32>
    %22 = arith.divf %20, %21 : vector<32x1xf32>
    %23 = vector.broadcast %15 : vector<32x1xf32> to vector<32x32xf32>
    %24 = arith.subf %9, %23 : vector<32x32xf32>
    %cst_13 = arith.constant 9.99999974E-6 : f32
    %25 = vector.broadcast %cst_13 : f32 to vector<32x1xf32>
    %26 = arith.addf %22, %25 : vector<32x1xf32>
    %27 = math.rsqrt %26 : vector<32x1xf32>
    %28 = vector.broadcast %27 : vector<32x1xf32> to vector<32x32xf32>
    %29 = arith.mulf %24, %28 : vector<32x32xf32>
    %30 = vector.broadcast %10 : vector<1x32xf32> to vector<32x32xf32>
    %31 = arith.mulf %29, %30 : vector<32x32xf32>
    %32 = vector.broadcast %11 : vector<1x32xf32> to vector<32x32xf32>
    %33 = arith.addf %31, %32 : vector<32x32xf32>
    %cst_14 = arith.constant 0.000000e+00 : f32
    %34 = vector.broadcast %cst_14 : f32 to vector<32x32xf32>
    %35 = arith.maximumf %33, %34 : vector<32x32xf32>
    %36 = tpu.iota {dimensions = array<i32: 0>} : vector<16x1xi32>
    %c0_15 = arith.constant 0 : index
    %37 = memref.load %arg1[%c0_15] : memref<2xi32, #tpu.memory_space<smem>>
    %38 = vector.broadcast %37 : i32 to vector<16x1xi32>
    %39 = arith.cmpi slt, %36, %38 : vector<16x1xi32>
    %40 = arith.extui %39 : vector<16x1xi1> to vector<16x1xi32>
    %41 = arith.sitofp %40 : vector<16x1xi32> to vector<16x1xf32>
    %c1 = arith.constant 1 : index
    %42 = memref.load %arg1[%c1] : memref<2xi32, #tpu.memory_space<smem>>
    %43 = vector.broadcast %42 : i32 to vector<16x1xi32>
    %44 = arith.cmpi slt, %36, %43 : vector<16x1xi32>
    %45 = arith.extui %44 : vector<16x1xi1> to vector<16x1xi32>
    %46 = arith.sitofp %45 : vector<16x1xi32> to vector<16x1xf32>
    %c14_i32 = arith.constant 14 : i32
    %47 = vector.broadcast %c14_i32 : i32 to vector<16x1xi32>
    %48 = arith.cmpi slt, %36, %47 : vector<16x1xi32>
    %49 = arith.extui %48 : vector<16x1xi1> to vector<16x1xi32>
    %50 = arith.sitofp %49 : vector<16x1xi32> to vector<16x1xf32>
    %c0_16 = arith.constant 0 : index
    %c0_17 = arith.constant 0 : index
    %c0_18 = arith.constant 0 : index
    %51 = vector.load %arg7[%c0_16, %c0_17, %c0_18] : memref<2x32x96xf32, #tpu.memory_space<vmem>>, vector<2x32x96xf32>
    %52 = arith.truncf %35 : vector<32x32xf32> to vector<32x32xbf16>
    %53 = vector.extract_strided_slice %51 {offsets = [0, 0, 0], sizes = [1, 32, 96], strides = [1, 1, 1]} : vector<2x32x96xf32> to vector<1x32x96xf32>
    %54 = vector.shape_cast %53 : vector<1x32x96xf32> to vector<32x96xf32>
    %55 = arith.truncf %54 : vector<32x96xf32> to vector<32x96xbf16>
    %cst_19 = arith.constant dense<0.000000e+00> : vector<32x96xf32>
    %56 = tpu.matmul %52, %55, %cst_19 {dimension_numbers = #tpu.dot_dimension_numbers<[1], [0], [0], [1], [0, 0, 1, 1], [], []>} : vector<32x32xbf16>, vector<32x96xbf16>, vector<32x96xf32> -> vector<32x96xf32>
    %57 = vector.extract_strided_slice %56 {offsets = [0, 0], sizes = [32, 32], strides = [1, 1]} : vector<32x96xf32> to vector<32x32xf32>
    %58 = vector.extract_strided_slice %56 {offsets = [0, 32], sizes = [32, 32], strides = [1, 1]} : vector<32x96xf32> to vector<32x32xf32>
    %59 = vector.extract_strided_slice %56 {offsets = [0, 64], sizes = [32, 32], strides = [1, 1]} : vector<32x96xf32> to vector<32x32xf32>
    %cst_20 = arith.constant 0.000000e+00 : f32
    %60 = vector.broadcast %cst_20 : f32 to vector<32x32xf32>
    %61 = arith.cmpf oeq, %57, %60 : vector<32x32xf32>
    %cst_21 = arith.constant 9.99999997E-7 : f32
    %62 = vector.broadcast %cst_21 : f32 to vector<32x32xf32>
    %63 = arith.select %61, %62, %57 : vector<32x32xi1>, vector<32x32xf32>
    %cst_22 = arith.constant 0.000000e+00 : f32
    %64 = vector.broadcast %cst_22 : f32 to vector<32x32xf32>
    %65 = arith.cmpf oeq, %58, %64 : vector<32x32xf32>
    %cst_23 = arith.constant 9.99999997E-7 : f32
    %66 = vector.broadcast %cst_23 : f32 to vector<32x32xf32>
    %67 = arith.select %65, %66, %58 : vector<32x32xi1>, vector<32x32xf32>
    %68 = vector.extract_strided_slice %63 {offsets = [0, 0], sizes = [16, 32], strides = [1, 1]} : vector<32x32xf32> to vector<16x32xf32>
    %69 = vector.extract_strided_slice %67 {offsets = [0, 0], sizes = [16, 32], strides = [1, 1]} : vector<32x32xf32> to vector<16x32xf32>
    %70 = vector.broadcast %50 : vector<16x1xf32> to vector<16x32xf32>
    %71 = arith.mulf %68, %70 : vector<16x32xf32>
    %72 = arith.mulf %71, %71 : vector<16x32xf32>
    %73 = vector.shape_cast %72 : vector<16x32xf32> to vector<1x16x32xf32>
    %cst_24 = arith.constant dense<0.000000e+00> : vector<1xf32>
    %74 = vector.multi_reduction <add>, %73, %cst_24 [1, 2] : vector<1x16x32xf32> to vector<1xf32>
    %75 = vector.shape_cast %74 : vector<1xf32> to vector<1x1x1xf32>
    %76 = vector.extract %75[0, 0, 0] : f32 from vector<1x1x1xf32>
    %cst_25 = arith.constant 0.000000e+00 : f32
    %77 = arith.addf %cst_25, %76 : f32
    %78 = vector.broadcast %50 : vector<16x1xf32> to vector<16x32xf32>
    %79 = arith.mulf %69, %78 : vector<16x32xf32>
    %80 = arith.mulf %79, %79 : vector<16x32xf32>
    %81 = vector.shape_cast %80 : vector<16x32xf32> to vector<1x16x32xf32>
    %cst_26 = arith.constant dense<0.000000e+00> : vector<1xf32>
    %82 = vector.multi_reduction <add>, %81, %cst_26 [1, 2] : vector<1x16x32xf32> to vector<1xf32>
    %83 = vector.shape_cast %82 : vector<1xf32> to vector<1x1x1xf32>
    %84 = vector.extract %83[0, 0, 0] : f32 from vector<1x1x1xf32>
    %cst_27 = arith.constant 0.000000e+00 : f32
    %85 = arith.addf %cst_27, %84 : f32
    %86 = vector.extract_strided_slice %63 {offsets = [16, 0], sizes = [16, 32], strides = [1, 1]} : vector<32x32xf32> to vector<16x32xf32>
    %87 = vector.extract_strided_slice %67 {offsets = [16, 0], sizes = [16, 32], strides = [1, 1]} : vector<32x32xf32> to vector<16x32xf32>
    %88 = vector.broadcast %50 : vector<16x1xf32> to vector<16x32xf32>
    %89 = arith.mulf %86, %88 : vector<16x32xf32>
    %90 = arith.mulf %89, %89 : vector<16x32xf32>
    %91 = vector.shape_cast %90 : vector<16x32xf32> to vector<1x16x32xf32>
    %cst_28 = arith.constant dense<0.000000e+00> : vector<1xf32>
    %92 = vector.multi_reduction <add>, %91, %cst_28 [1, 2] : vector<1x16x32xf32> to vector<1xf32>
    %93 = vector.shape_cast %92 : vector<1xf32> to vector<1x1x1xf32>
    %94 = vector.extract %93[0, 0, 0] : f32 from vector<1x1x1xf32>
    %95 = arith.addf %77, %94 : f32
    %96 = vector.broadcast %50 : vector<16x1xf32> to vector<16x32xf32>
    %97 = arith.mulf %87, %96 : vector<16x32xf32>
    %98 = arith.mulf %97, %97 : vector<16x32xf32>
    %99 = vector.shape_cast %98 : vector<16x32xf32> to vector<1x16x32xf32>
    %cst_29 = arith.constant dense<0.000000e+00> : vector<1xf32>
    %100 = vector.multi_reduction <add>, %99, %cst_29 [1, 2] : vector<1x16x32xf32> to vector<1xf32>
    %101 = vector.shape_cast %100 : vector<1xf32> to vector<1x1x1xf32>
    %102 = vector.extract %101[0, 0, 0] : f32 from vector<1x1x1xf32>
    %103 = arith.addf %85, %102 : f32
    %104 = arith.mulf %95, %103 : f32
    %105 = math.rsqrt %104 : f32
    %106 = vector.extract_strided_slice %63 {offsets = [0, 0], sizes = [16, 32], strides = [1, 1]} : vector<32x32xf32> to vector<16x32xf32>
    %107 = vector.extract_strided_slice %67 {offsets = [0, 0], sizes = [16, 32], strides = [1, 1]} : vector<32x32xf32> to vector<16x32xf32>
    %108 = vector.extract_strided_slice %59 {offsets = [0, 0], sizes = [16, 32], strides = [1, 1]} : vector<32x32xf32> to vector<16x32xf32>
    %109 = vector.broadcast %41 : vector<16x1xf32> to vector<16x32xf32>
    %110 = arith.mulf %108, %109 : vector<16x32xf32>
    %111 = arith.truncf %107 : vector<16x32xf32> to vector<16x32xbf16>
    %112 = arith.truncf %110 : vector<16x32xf32> to vector<16x32xbf16>
    %cst_30 = arith.constant dense<0.000000e+00> : vector<32x32xf32>
    %113 = tpu.matmul %111, %112, %cst_30 {dimension_numbers = #tpu.dot_dimension_numbers<[0], [0], [1], [1], [0, 1, 1, 1], [], []>} : vector<16x32xbf16>, vector<16x32xbf16>, vector<32x32xf32> -> vector<32x32xf32>
    %114 = arith.truncf %106 : vector<16x32xf32> to vector<16x32xbf16>
    %115 = arith.truncf %113 : vector<32x32xf32> to vector<32x32xbf16>
    %cst_31 = arith.constant dense<0.000000e+00> : vector<16x32xf32>
    %116 = tpu.matmul %114, %115, %cst_31 {dimension_numbers = #tpu.dot_dimension_numbers<[1], [0], [0], [1], [0, 0, 1, 1], [], []>} : vector<16x32xbf16>, vector<32x32xbf16>, vector<16x32xf32> -> vector<16x32xf32>
    %117 = vector.broadcast %105 : f32 to vector<16x32xf32>
    %118 = arith.mulf %116, %117 : vector<16x32xf32>
    %cst_32 = arith.constant 1.400000e+01 : f32
    %119 = vector.broadcast %cst_32 : f32 to vector<16x32xf32>
    %120 = arith.mulf %119, %110 : vector<16x32xf32>
    %121 = arith.addf %118, %120 : vector<16x32xf32>
    %122 = vector.broadcast %50 : vector<16x1xf32> to vector<16x32xf32>
    %123 = arith.mulf %107, %122 : vector<16x32xf32>
    %cst_33 = arith.constant dense<0.000000e+00> : vector<32xf32>
    %124 = vector.multi_reduction <add>, %123, %cst_33 [0] : vector<16x32xf32> to vector<32xf32>
    %125 = vector.shape_cast %124 : vector<32xf32> to vector<1x32xf32>
    %126 = vector.broadcast %125 : vector<1x32xf32> to vector<16x32xf32>
    %127 = arith.mulf %106, %126 : vector<16x32xf32>
    %cst_34 = arith.constant dense<0.000000e+00> : vector<16xf32>
    %128 = vector.multi_reduction <add>, %127, %cst_34 [1] : vector<16x32xf32> to vector<16xf32>
    %129 = vector.shape_cast %128 : vector<16xf32> to vector<16x1xf32>
    %130 = vector.broadcast %105 : f32 to vector<16x1xf32>
    %131 = arith.mulf %129, %130 : vector<16x1xf32>
    %cst_35 = arith.constant 1.400000e+01 : f32
    %132 = vector.broadcast %cst_35 : f32 to vector<16x1xf32>
    %133 = arith.addf %131, %132 : vector<16x1xf32>
    %134 = vector.broadcast %133 : vector<16x1xf32> to vector<16x32xf32>
    %135 = arith.divf %121, %134 : vector<16x32xf32>
    %136 = vector.extract_strided_slice %63 {offsets = [16, 0], sizes = [16, 32], strides = [1, 1]} : vector<32x32xf32> to vector<16x32xf32>
    %137 = vector.extract_strided_slice %67 {offsets = [16, 0], sizes = [16, 32], strides = [1, 1]} : vector<32x32xf32> to vector<16x32xf32>
    %138 = vector.extract_strided_slice %59 {offsets = [16, 0], sizes = [16, 32], strides = [1, 1]} : vector<32x32xf32> to vector<16x32xf32>
    %139 = vector.broadcast %46 : vector<16x1xf32> to vector<16x32xf32>
    %140 = arith.mulf %138, %139 : vector<16x32xf32>
    %141 = arith.truncf %137 : vector<16x32xf32> to vector<16x32xbf16>
    %142 = arith.truncf %140 : vector<16x32xf32> to vector<16x32xbf16>
    %cst_36 = arith.constant dense<0.000000e+00> : vector<32x32xf32>
    %143 = tpu.matmul %141, %142, %cst_36 {dimension_numbers = #tpu.dot_dimension_numbers<[0], [0], [1], [1], [0, 1, 1, 1], [], []>} : vector<16x32xbf16>, vector<16x32xbf16>, vector<32x32xf32> -> vector<32x32xf32>
    %144 = arith.truncf %136 : vector<16x32xf32> to vector<16x32xbf16>
    %145 = arith.truncf %143 : vector<32x32xf32> to vector<32x32xbf16>
    %cst_37 = arith.constant dense<0.000000e+00> : vector<16x32xf32>
    %146 = tpu.matmul %144, %145, %cst_37 {dimension_numbers = #tpu.dot_dimension_numbers<[1], [0], [0], [1], [0, 0, 1, 1], [], []>} : vector<16x32xbf16>, vector<32x32xbf16>, vector<16x32xf32> -> vector<16x32xf32>
    %147 = vector.broadcast %105 : f32 to vector<16x32xf32>
    %148 = arith.mulf %146, %147 : vector<16x32xf32>
    %cst_38 = arith.constant 1.400000e+01 : f32
    %149 = vector.broadcast %cst_38 : f32 to vector<16x32xf32>
    %150 = arith.mulf %149, %140 : vector<16x32xf32>
    %151 = arith.addf %148, %150 : vector<16x32xf32>
    %152 = vector.broadcast %50 : vector<16x1xf32> to vector<16x32xf32>
    %153 = arith.mulf %137, %152 : vector<16x32xf32>
    %cst_39 = arith.constant dense<0.000000e+00> : vector<32xf32>
    %154 = vector.multi_reduction <add>, %153, %cst_39 [0] : vector<16x32xf32> to vector<32xf32>
    %155 = vector.shape_cast %154 : vector<32xf32> to vector<1x32xf32>
    %156 = vector.broadcast %155 : vector<1x32xf32> to vector<16x32xf32>
    %157 = arith.mulf %136, %156 : vector<16x32xf32>
    %cst_40 = arith.constant dense<0.000000e+00> : vector<16xf32>
    %158 = vector.multi_reduction <add>, %157, %cst_40 [1] : vector<16x32xf32> to vector<16xf32>
    %159 = vector.shape_cast %158 : vector<16xf32> to vector<16x1xf32>
    %160 = vector.broadcast %105 : f32 to vector<16x1xf32>
    %161 = arith.mulf %159, %160 : vector<16x1xf32>
    %cst_41 = arith.constant 1.400000e+01 : f32
    %162 = vector.broadcast %cst_41 : f32 to vector<16x1xf32>
    %163 = arith.addf %161, %162 : vector<16x1xf32>
    %164 = vector.broadcast %163 : vector<16x1xf32> to vector<16x32xf32>
    %165 = arith.divf %151, %164 : vector<16x32xf32>
    %166 = tpu.concatenate %135, %165 in 0 : vector<16x32xf32>, vector<16x32xf32> -> vector<32x32xf32>
    %167 = arith.addf %166, %35 : vector<32x32xf32>
    %cst_42 = arith.constant 5.000000e-01 : f32
    %168 = vector.broadcast %cst_42 : f32 to vector<32x32xf32>
    %169 = arith.mulf %167, %168 : vector<32x32xf32>
    %170 = vector.extract_strided_slice %0 {offsets = [1, 0], sizes = [1, 32], strides = [1, 1]} : vector<3x32xf32> to vector<1x32xf32>
    %171 = vector.extract_strided_slice %1 {offsets = [1, 0], sizes = [1, 32], strides = [1, 1]} : vector<3x32xf32> to vector<1x32xf32>
    %cst_43 = arith.constant dense<0.000000e+00> : vector<32xf32>
    %172 = vector.multi_reduction <add>, %169, %cst_43 [1] : vector<32x32xf32> to vector<32xf32>
    %173 = vector.shape_cast %172 : vector<32xf32> to vector<32x1xf32>
    %cst_44 = arith.constant 3.200000e+01 : f32
    %174 = vector.broadcast %cst_44 : f32 to vector<32x1xf32>
    %175 = arith.divf %173, %174 : vector<32x1xf32>
    %176 = vector.broadcast %175 : vector<32x1xf32> to vector<32x32xf32>
    %177 = arith.subf %169, %176 : vector<32x32xf32>
    %178 = arith.mulf %177, %177 : vector<32x32xf32>
    %cst_45 = arith.constant dense<0.000000e+00> : vector<32xf32>
    %179 = vector.multi_reduction <add>, %178, %cst_45 [1] : vector<32x32xf32> to vector<32xf32>
    %180 = vector.shape_cast %179 : vector<32xf32> to vector<32x1xf32>
    %cst_46 = arith.constant 3.200000e+01 : f32
    %181 = vector.broadcast %cst_46 : f32 to vector<32x1xf32>
    %182 = arith.divf %180, %181 : vector<32x1xf32>
    %183 = vector.broadcast %175 : vector<32x1xf32> to vector<32x32xf32>
    %184 = arith.subf %169, %183 : vector<32x32xf32>
    %cst_47 = arith.constant 9.99999974E-6 : f32
    %185 = vector.broadcast %cst_47 : f32 to vector<32x1xf32>
    %186 = arith.addf %182, %185 : vector<32x1xf32>
    %187 = math.rsqrt %186 : vector<32x1xf32>
    %188 = vector.broadcast %187 : vector<32x1xf32> to vector<32x32xf32>
    %189 = arith.mulf %184, %188 : vector<32x32xf32>
    %190 = vector.broadcast %170 : vector<1x32xf32> to vector<32x32xf32>
    %191 = arith.mulf %189, %190 : vector<32x32xf32>
    %192 = vector.broadcast %171 : vector<1x32xf32> to vector<32x32xf32>
    %193 = arith.addf %191, %192 : vector<32x32xf32>
    %cst_48 = arith.constant 0.000000e+00 : f32
    %194 = vector.broadcast %cst_48 : f32 to vector<32x32xf32>
    %195 = arith.maximumf %193, %194 : vector<32x32xf32>
    %196 = arith.truncf %195 : vector<32x32xf32> to vector<32x32xbf16>
    %197 = vector.extract_strided_slice %51 {offsets = [1, 0, 0], sizes = [1, 32, 96], strides = [1, 1, 1]} : vector<2x32x96xf32> to vector<1x32x96xf32>
    %198 = vector.shape_cast %197 : vector<1x32x96xf32> to vector<32x96xf32>
    %199 = arith.truncf %198 : vector<32x96xf32> to vector<32x96xbf16>
    %cst_49 = arith.constant dense<0.000000e+00> : vector<32x96xf32>
    %200 = tpu.matmul %196, %199, %cst_49 {dimension_numbers = #tpu.dot_dimension_numbers<[1], [0], [0], [1], [0, 0, 1, 1], [], []>} : vector<32x32xbf16>, vector<32x96xbf16>, vector<32x96xf32> -> vector<32x96xf32>
    %201 = vector.extract_strided_slice %200 {offsets = [0, 0], sizes = [32, 32], strides = [1, 1]} : vector<32x96xf32> to vector<32x32xf32>
    %202 = vector.extract_strided_slice %200 {offsets = [0, 32], sizes = [32, 32], strides = [1, 1]} : vector<32x96xf32> to vector<32x32xf32>
    %203 = vector.extract_strided_slice %200 {offsets = [0, 64], sizes = [32, 32], strides = [1, 1]} : vector<32x96xf32> to vector<32x32xf32>
    %cst_50 = arith.constant 0.000000e+00 : f32
    %204 = vector.broadcast %cst_50 : f32 to vector<32x32xf32>
    %205 = arith.cmpf oeq, %201, %204 : vector<32x32xf32>
    %cst_51 = arith.constant 9.99999997E-7 : f32
    %206 = vector.broadcast %cst_51 : f32 to vector<32x32xf32>
    %207 = arith.select %205, %206, %201 : vector<32x32xi1>, vector<32x32xf32>
    %cst_52 = arith.constant 0.000000e+00 : f32
    %208 = vector.broadcast %cst_52 : f32 to vector<32x32xf32>
    %209 = arith.cmpf oeq, %202, %208 : vector<32x32xf32>
    %cst_53 = arith.constant 9.99999997E-7 : f32
    %210 = vector.broadcast %cst_53 : f32 to vector<32x32xf32>
    %211 = arith.select %209, %210, %202 : vector<32x32xi1>, vector<32x32xf32>
    %212 = vector.extract_strided_slice %207 {offsets = [0, 0], sizes = [16, 32], strides = [1, 1]} : vector<32x32xf32> to vector<16x32xf32>
    %213 = vector.extract_strided_slice %211 {offsets = [0, 0], sizes = [16, 32], strides = [1, 1]} : vector<32x32xf32> to vector<16x32xf32>
    %214 = vector.broadcast %50 : vector<16x1xf32> to vector<16x32xf32>
    %215 = arith.mulf %212, %214 : vector<16x32xf32>
    %216 = arith.mulf %215, %215 : vector<16x32xf32>
    %217 = vector.shape_cast %216 : vector<16x32xf32> to vector<1x16x32xf32>
    %cst_54 = arith.constant dense<0.000000e+00> : vector<1xf32>
    %218 = vector.multi_reduction <add>, %217, %cst_54 [1, 2] : vector<1x16x32xf32> to vector<1xf32>
    %219 = vector.shape_cast %218 : vector<1xf32> to vector<1x1x1xf32>
    %220 = vector.extract %219[0, 0, 0] : f32 from vector<1x1x1xf32>
    %cst_55 = arith.constant 0.000000e+00 : f32
    %221 = arith.addf %cst_55, %220 : f32
    %222 = vector.broadcast %50 : vector<16x1xf32> to vector<16x32xf32>
    %223 = arith.mulf %213, %222 : vector<16x32xf32>
    %224 = arith.mulf %223, %223 : vector<16x32xf32>
    %225 = vector.shape_cast %224 : vector<16x32xf32> to vector<1x16x32xf32>
    %cst_56 = arith.constant dense<0.000000e+00> : vector<1xf32>
    %226 = vector.multi_reduction <add>, %225, %cst_56 [1, 2] : vector<1x16x32xf32> to vector<1xf32>
    %227 = vector.shape_cast %226 : vector<1xf32> to vector<1x1x1xf32>
    %228 = vector.extract %227[0, 0, 0] : f32 from vector<1x1x1xf32>
    %cst_57 = arith.constant 0.000000e+00 : f32
    %229 = arith.addf %cst_57, %228 : f32
    %230 = vector.extract_strided_slice %207 {offsets = [16, 0], sizes = [16, 32], strides = [1, 1]} : vector<32x32xf32> to vector<16x32xf32>
    %231 = vector.extract_strided_slice %211 {offsets = [16, 0], sizes = [16, 32], strides = [1, 1]} : vector<32x32xf32> to vector<16x32xf32>
    %232 = vector.broadcast %50 : vector<16x1xf32> to vector<16x32xf32>
    %233 = arith.mulf %230, %232 : vector<16x32xf32>
    %234 = arith.mulf %233, %233 : vector<16x32xf32>
    %235 = vector.shape_cast %234 : vector<16x32xf32> to vector<1x16x32xf32>
    %cst_58 = arith.constant dense<0.000000e+00> : vector<1xf32>
    %236 = vector.multi_reduction <add>, %235, %cst_58 [1, 2] : vector<1x16x32xf32> to vector<1xf32>
    %237 = vector.shape_cast %236 : vector<1xf32> to vector<1x1x1xf32>
    %238 = vector.extract %237[0, 0, 0] : f32 from vector<1x1x1xf32>
    %239 = arith.addf %221, %238 : f32
    %240 = vector.broadcast %50 : vector<16x1xf32> to vector<16x32xf32>
    %241 = arith.mulf %231, %240 : vector<16x32xf32>
    %242 = arith.mulf %241, %241 : vector<16x32xf32>
    %243 = vector.shape_cast %242 : vector<16x32xf32> to vector<1x16x32xf32>
    %cst_59 = arith.constant dense<0.000000e+00> : vector<1xf32>
    %244 = vector.multi_reduction <add>, %243, %cst_59 [1, 2] : vector<1x16x32xf32> to vector<1xf32>
    %245 = vector.shape_cast %244 : vector<1xf32> to vector<1x1x1xf32>
    %246 = vector.extract %245[0, 0, 0] : f32 from vector<1x1x1xf32>
    %247 = arith.addf %229, %246 : f32
    %248 = arith.mulf %239, %247 : f32
    %249 = math.rsqrt %248 : f32
    %250 = vector.extract_strided_slice %207 {offsets = [0, 0], sizes = [16, 32], strides = [1, 1]} : vector<32x32xf32> to vector<16x32xf32>
    %251 = vector.extract_strided_slice %211 {offsets = [0, 0], sizes = [16, 32], strides = [1, 1]} : vector<32x32xf32> to vector<16x32xf32>
    %252 = vector.extract_strided_slice %203 {offsets = [0, 0], sizes = [16, 32], strides = [1, 1]} : vector<32x32xf32> to vector<16x32xf32>
    %253 = vector.broadcast %41 : vector<16x1xf32> to vector<16x32xf32>
    %254 = arith.mulf %252, %253 : vector<16x32xf32>
    %255 = arith.truncf %251 : vector<16x32xf32> to vector<16x32xbf16>
    %256 = arith.truncf %254 : vector<16x32xf32> to vector<16x32xbf16>
    %cst_60 = arith.constant dense<0.000000e+00> : vector<32x32xf32>
    %257 = tpu.matmul %255, %256, %cst_60 {dimension_numbers = #tpu.dot_dimension_numbers<[0], [0], [1], [1], [0, 1, 1, 1], [], []>} : vector<16x32xbf16>, vector<16x32xbf16>, vector<32x32xf32> -> vector<32x32xf32>
    %258 = arith.truncf %250 : vector<16x32xf32> to vector<16x32xbf16>
    %259 = arith.truncf %257 : vector<32x32xf32> to vector<32x32xbf16>
    %cst_61 = arith.constant dense<0.000000e+00> : vector<16x32xf32>
    %260 = tpu.matmul %258, %259, %cst_61 {dimension_numbers = #tpu.dot_dimension_numbers<[1], [0], [0], [1], [0, 0, 1, 1], [], []>} : vector<16x32xbf16>, vector<32x32xbf16>, vector<16x32xf32> -> vector<16x32xf32>
    %261 = vector.broadcast %249 : f32 to vector<16x32xf32>
    %262 = arith.mulf %260, %261 : vector<16x32xf32>
    %cst_62 = arith.constant 1.400000e+01 : f32
    %263 = vector.broadcast %cst_62 : f32 to vector<16x32xf32>
    %264 = arith.mulf %263, %254 : vector<16x32xf32>
    %265 = arith.addf %262, %264 : vector<16x32xf32>
    %266 = vector.broadcast %50 : vector<16x1xf32> to vector<16x32xf32>
    %267 = arith.mulf %251, %266 : vector<16x32xf32>
    %cst_63 = arith.constant dense<0.000000e+00> : vector<32xf32>
    %268 = vector.multi_reduction <add>, %267, %cst_63 [0] : vector<16x32xf32> to vector<32xf32>
    %269 = vector.shape_cast %268 : vector<32xf32> to vector<1x32xf32>
    %270 = vector.broadcast %269 : vector<1x32xf32> to vector<16x32xf32>
    %271 = arith.mulf %250, %270 : vector<16x32xf32>
    %cst_64 = arith.constant dense<0.000000e+00> : vector<16xf32>
    %272 = vector.multi_reduction <add>, %271, %cst_64 [1] : vector<16x32xf32> to vector<16xf32>
    %273 = vector.shape_cast %272 : vector<16xf32> to vector<16x1xf32>
    %274 = vector.broadcast %249 : f32 to vector<16x1xf32>
    %275 = arith.mulf %273, %274 : vector<16x1xf32>
    %cst_65 = arith.constant 1.400000e+01 : f32
    %276 = vector.broadcast %cst_65 : f32 to vector<16x1xf32>
    %277 = arith.addf %275, %276 : vector<16x1xf32>
    %278 = vector.broadcast %277 : vector<16x1xf32> to vector<16x32xf32>
    %279 = arith.divf %265, %278 : vector<16x32xf32>
    %280 = vector.extract_strided_slice %207 {offsets = [16, 0], sizes = [16, 32], strides = [1, 1]} : vector<32x32xf32> to vector<16x32xf32>
    %281 = vector.extract_strided_slice %211 {offsets = [16, 0], sizes = [16, 32], strides = [1, 1]} : vector<32x32xf32> to vector<16x32xf32>
    %282 = vector.extract_strided_slice %203 {offsets = [16, 0], sizes = [16, 32], strides = [1, 1]} : vector<32x32xf32> to vector<16x32xf32>
    %283 = vector.broadcast %46 : vector<16x1xf32> to vector<16x32xf32>
    %284 = arith.mulf %282, %283 : vector<16x32xf32>
    %285 = arith.truncf %281 : vector<16x32xf32> to vector<16x32xbf16>
    %286 = arith.truncf %284 : vector<16x32xf32> to vector<16x32xbf16>
    %cst_66 = arith.constant dense<0.000000e+00> : vector<32x32xf32>
    %287 = tpu.matmul %285, %286, %cst_66 {dimension_numbers = #tpu.dot_dimension_numbers<[0], [0], [1], [1], [0, 1, 1, 1], [], []>} : vector<16x32xbf16>, vector<16x32xbf16>, vector<32x32xf32> -> vector<32x32xf32>
    %288 = arith.truncf %280 : vector<16x32xf32> to vector<16x32xbf16>
    %289 = arith.truncf %287 : vector<32x32xf32> to vector<32x32xbf16>
    %cst_67 = arith.constant dense<0.000000e+00> : vector<16x32xf32>
    %290 = tpu.matmul %288, %289, %cst_67 {dimension_numbers = #tpu.dot_dimension_numbers<[1], [0], [0], [1], [0, 0, 1, 1], [], []>} : vector<16x32xbf16>, vector<32x32xbf16>, vector<16x32xf32> -> vector<16x32xf32>
    %291 = vector.broadcast %249 : f32 to vector<16x32xf32>
    %292 = arith.mulf %290, %291 : vector<16x32xf32>
    %cst_68 = arith.constant 1.400000e+01 : f32
    %293 = vector.broadcast %cst_68 : f32 to vector<16x32xf32>
    %294 = arith.mulf %293, %284 : vector<16x32xf32>
    %295 = arith.addf %292, %294 : vector<16x32xf32>
    %296 = vector.broadcast %50 : vector<16x1xf32> to vector<16x32xf32>
    %297 = arith.mulf %281, %296 : vector<16x32xf32>
    %cst_69 = arith.constant dense<0.000000e+00> : vector<32xf32>
    %298 = vector.multi_reduction <add>, %297, %cst_69 [0] : vector<16x32xf32> to vector<32xf32>
    %299 = vector.shape_cast %298 : vector<32xf32> to vector<1x32xf32>
    %300 = vector.broadcast %299 : vector<1x32xf32> to vector<16x32xf32>
    %301 = arith.mulf %280, %300 : vector<16x32xf32>
    %cst_70 = arith.constant dense<0.000000e+00> : vector<16xf32>
    %302 = vector.multi_reduction <add>, %301, %cst_70 [1] : vector<16x32xf32> to vector<16xf32>
    %303 = vector.shape_cast %302 : vector<16xf32> to vector<16x1xf32>
    %304 = vector.broadcast %249 : f32 to vector<16x1xf32>
    %305 = arith.mulf %303, %304 : vector<16x1xf32>
    %cst_71 = arith.constant 1.400000e+01 : f32
    %306 = vector.broadcast %cst_71 : f32 to vector<16x1xf32>
    %307 = arith.addf %305, %306 : vector<16x1xf32>
    %308 = vector.broadcast %307 : vector<16x1xf32> to vector<16x32xf32>
    %309 = arith.divf %295, %308 : vector<16x32xf32>
    %310 = tpu.concatenate %279, %309 in 0 : vector<16x32xf32>, vector<16x32xf32> -> vector<32x32xf32>
    %311 = arith.addf %310, %195 : vector<32x32xf32>
    %cst_72 = arith.constant 5.000000e-01 : f32
    %312 = vector.broadcast %cst_72 : f32 to vector<32x32xf32>
    %313 = arith.mulf %311, %312 : vector<32x32xf32>
    %314 = vector.extract_strided_slice %0 {offsets = [2, 0], sizes = [1, 32], strides = [1, 1]} : vector<3x32xf32> to vector<1x32xf32>
    %315 = vector.extract_strided_slice %1 {offsets = [2, 0], sizes = [1, 32], strides = [1, 1]} : vector<3x32xf32> to vector<1x32xf32>
    %cst_73 = arith.constant dense<0.000000e+00> : vector<32xf32>
    %316 = vector.multi_reduction <add>, %313, %cst_73 [1] : vector<32x32xf32> to vector<32xf32>
    %317 = vector.shape_cast %316 : vector<32xf32> to vector<32x1xf32>
    %cst_74 = arith.constant 3.200000e+01 : f32
    %318 = vector.broadcast %cst_74 : f32 to vector<32x1xf32>
    %319 = arith.divf %317, %318 : vector<32x1xf32>
    %320 = vector.broadcast %319 : vector<32x1xf32> to vector<32x32xf32>
    %321 = arith.subf %313, %320 : vector<32x32xf32>
    %322 = arith.mulf %321, %321 : vector<32x32xf32>
    %cst_75 = arith.constant dense<0.000000e+00> : vector<32xf32>
    %323 = vector.multi_reduction <add>, %322, %cst_75 [1] : vector<32x32xf32> to vector<32xf32>
    %324 = vector.shape_cast %323 : vector<32xf32> to vector<32x1xf32>
    %cst_76 = arith.constant 3.200000e+01 : f32
    %325 = vector.broadcast %cst_76 : f32 to vector<32x1xf32>
    %326 = arith.divf %324, %325 : vector<32x1xf32>
    %327 = vector.broadcast %319 : vector<32x1xf32> to vector<32x32xf32>
    %328 = arith.subf %313, %327 : vector<32x32xf32>
    %cst_77 = arith.constant 9.99999974E-6 : f32
    %329 = vector.broadcast %cst_77 : f32 to vector<32x1xf32>
    %330 = arith.addf %326, %329 : vector<32x1xf32>
    %331 = math.rsqrt %330 : vector<32x1xf32>
    %332 = vector.broadcast %331 : vector<32x1xf32> to vector<32x32xf32>
    %333 = arith.mulf %328, %332 : vector<32x32xf32>
    %334 = vector.broadcast %314 : vector<1x32xf32> to vector<32x32xf32>
    %335 = arith.mulf %333, %334 : vector<32x32xf32>
    %336 = vector.broadcast %315 : vector<1x32xf32> to vector<32x32xf32>
    %337 = arith.addf %335, %336 : vector<32x32xf32>
    %cst_78 = arith.constant 0.000000e+00 : f32
    %338 = vector.broadcast %cst_78 : f32 to vector<32x32xf32>
    %339 = arith.maximumf %337, %338 : vector<32x32xf32>
    %c0_79 = arith.constant 0 : index
    %c0_80 = arith.constant 0 : index
    %340 = vector.load %arg8[%c0_79, %c0_80] : memref<32x32xf32, #tpu.memory_space<vmem>>, vector<32x32xf32>
    tpu.vector_store %arg8[%c0_79, %c0_80], %339 {strides = array<i32>} : memref<32x32xf32, #tpu.memory_space<vmem>>, vector<32x32xf32>,
    return
  }
  func.func @transform_0(%arg0: i32) -> i32 {
    %c0_i32 = arith.constant 0 : i32
    %c0_i32_0 = arith.constant 0 : i32
    return %c0_i32 : i32
  }
  func.func @transform_1(%arg0: i32) -> (i32, i32) {
    %c0_i32 = arith.constant 0 : i32
    %c0_i32_0 = arith.constant 0 : i32
    %c0_i32_1 = arith.constant 0 : i32
    return %c0_i32, %c0_i32_0 : i32, i32
  }
  func.func @transform_2(%arg0: i32) -> (i32, i32) {
    %c0_i32 = arith.constant 0 : i32
    %c0_i32_0 = arith.constant 0 : i32
    %c0_i32_1 = arith.constant 0 : i32
    return %c0_i32, %c0_i32_0 : i32, i32
  }
  func.func @transform_3(%arg0: i32) -> (i32, i32) {
    %c0_i32 = arith.constant 0 : i32
    %c0_i32_0 = arith.constant 0 : i32
    %c0_i32_1 = arith.constant 0 : i32
    return %c0_i32, %c0_i32_0 : i32, i32
  }
  func.func @transform_4(%arg0: i32) -> (i32, i32) {
    %c0_i32 = arith.constant 0 : i32
    %c0_i32_0 = arith.constant 0 : i32
    %c0_i32_1 = arith.constant 0 : i32
    return %c0_i32, %c0_i32_0 : i32, i32
  }
  func.func @transform_5(%arg0: i32) -> (i32, i32) {
    %c0_i32 = arith.constant 0 : i32
    %c0_i32_0 = arith.constant 0 : i32
    %c0_i32_1 = arith.constant 0 : i32
    return %c0_i32, %c0_i32_0 : i32, i32
  }
  func.func @transform_6(%arg0: i32) -> (i32, i32, i32) {
    %c0_i32 = arith.constant 0 : i32
    %c0_i32_0 = arith.constant 0 : i32
    %c0_i32_1 = arith.constant 0 : i32
    %c0_i32_2 = arith.constant 0 : i32
    return %c0_i32, %c0_i32_0, %c0_i32_1 : i32, i32, i32
  }
  func.func @transform_7(%arg0: i32) -> (i32, i32) {
    %c0_i32 = arith.constant 0 : i32
    %c0_i32_0 = arith.constant 0 : i32
    %c0_i32_1 = arith.constant 0 : i32
    return %c0_i32, %c0_i32_0 : i32, i32
  }
}

</mosaic_0001>

<bundles_post_ra>
// kernel: sg_module_forward.1
= control target key start
LH: loop header
LB: loop body
LE: loop exit
PB: predicated region body
PF: predicated region fallthrough
CT: control target
= control target key end

     0   :  { %12 = vsyncpa [#allocation3], 0  ;;  %s2033_s0 = inlined_call_operand.vmem [shape: s32[2], index: 0, kind: input, shape index: {}]   ;;  %s2034_s1 = inlined_call_operand.vmem [shape: f32[32,16], index: 1, kind: input, shape index: {}]   ;;  %s2035_s2 = inlined_call_operand.vmem [shape: f32[16,32], index: 2, kind: input, shape index: {}]   ;;  %s2036_s3 = inlined_call_operand.vmem [shape: f32[1,32], index: 3, kind: input, shape index: {}]   ;;  %s2037_s4 = inlined_call_operand.vmem [shape: f32[3,32], index: 4, kind: input, shape index: {}]   ;;  %s2038_s5 = inlined_call_operand.vmem [shape: f32[3,32], index: 5, kind: input, shape index: {}]   ;;  %s2039_s6 = inlined_call_operand.vmem [shape: f32[2,32,96], index: 6, kind: input, shape index: {}]   ;;  %s2040_s7 = inlined_call_operand.vmem [shape: f32[32,32], index: 7, kind: output, shape index: {}]  }
   0x1   :  { %s19_s26 = sshll.u32 %s2033_s0, 4  ;;  %s20_s26 = int_to_ptr.vmem [resolvable:$true] %s19_s26 }
   0x2   :  { %s1585_s27 = scalar_lea.vmem %s20_s26, 16  ;;  %p1590_p1 = scmp.lt.s32.totalorder %s20_s26, %s20_s26 }
   0x3   :  { %p1586_p0 = scmp.ne.s32.totalorder %s20_s26, %s1585_s27  ;;  %p1591_p2 = scmp.lt.s32.totalorder %s1585_s27, %s1585_s27 }
   0x5   :  { %p1592_p3 = por %p1591_p2, %p1590_p1 }
   0x7   :  { %p1593_p4 = pnand %p1592_p3, %p1586_p0 }
   0x9   :  { %1596 = shalt.err (!%p1593_p4)
}
   0xa   :  { %s1599_s28 = smov [#allocation2]  }
   0xb   :  { %22 = dma.vmem_to_smem %s20_s26, 16, %s1599_s28, [#allocation3]  }
   0xc   :  { %1597 = dma.done.wait [#allocation3], 16  }
   0xd   :  { %1598 = vsyncadd [#allocation3], 4294967280 }
   0xe   :  { %38 = sfence }
   0xf   :  { %v48_v0 = vld [vmem:[%s2035_s2] sm:$0xff]  ;;  %v49_v1 = vld [vmem:[%s2035_s2 + $0x8] sm:$0xff]  ;;  %vm58_vm0 = vcmask 130048   ;;  %v44_v5 = vld [vmem:[%s2034_s1 + $0x10] sm:$0xff]  ;;  %vm114_vm1 = vcmask 261120   ;;  %v1600_v48 = vmov 0.0   ;;  %v168_v56 = vlaneseq }
  0x10   :  { %v42_v2 = vld [vmem:[%s2034_s1] sm:$0xff]  ;;  %v50_v3 = vpack.c.bf16 %v49_v1, %v48_v0  ;;  %v43_v4 = vld [vmem:[%s2034_s1 + $0x8] sm:$0xff]  ;;  %v45_v6 = vld [vmem:[%s2034_s1 + $0x18] sm:$0xff]  ;;  %s1380_s28 = sld [smem:[#allocation2 + $0x1]]  ;;  %s1601_s30 = smov 96   ;;  %vm512_vm11 = vcmask 523520  }
  0x11   :  { %v46_v7 = vpack.c.bf16 %v43_v4, %v42_v2  ;;  %v47_v8 = vpack.c.bf16 %v45_v6, %v44_v5  ;;  %v1375_v9 = vld [vmem:[%s2036_s3] ss:$0 sm:$0xff]  ;;  %v215_v42 = vld [vmem:[%s2039_s6 + $0x10] sm:$0xff]  ;;  %v216_v43 = vld [vmem:[%s2039_s6 + $0x18] sm:$0xff]  ;;  %v1691_v61 = vshrl.u32 %v168_v56, 7  ;;  %s191_s29 = sld [smem:[#allocation2]] }
  0x12   :  { %1435 = vmatprep.subr.bf16.mxu0 %v50_v3  ;;  %v213_v44 = vld [vmem:[%s2039_s6] sm:$0xff]  ;;  %v224_v45 = vpack.c.bf16 %v216_v43, %v215_v42  ;;  %v214_v46 = vld [vmem:[%s2039_s6 + $0x8] sm:$0xff]  ;;  %s1602_s8 = smov 64   ;;  %vm1603_vm12 = vmmov 0  }
  0x13   :  { %1436 = vmatpush3.bf16.msra.mxu0 %v50_v3  ;;  %1437 = vmatprep.mubr.msk.bf16.mxu0 %vm58_vm0, %v46_v7  ;;  %v223_v47 = vpack.c.bf16 %v214_v46, %v213_v44  ;;  %v170_v63 = vsub.s32 0, %v1691_v61  ;;  %v1697_v0 = vld [vmem:[%s2037_s4] sm:$0x7] }
  0x14   :  { %1441 = vmatprep.subr.bf16.mxu1 %v224_v45  ;;  %v1703_v3 = vld [vmem:[%s2038_s5] sm:$0x7] }
  0x15   :  { %1442 = vmatpush3.bf16.msra.mxu1 %v224_v45  ;;  %v171_v1 = vrot.slane %v1697_v0, %v170_v63  ;;  %v179_v6 = vrot.slane %v1703_v3, %v170_v63 }
  0x16   :  { %1438 = vmatmul.mubr.msk.bf16.vlgmr.msra.gmra.mxu0 %vm58_vm0, %v47_v8  ;;  %1443 = vmatprep.subr.bf16.mxu1 %v223_v47 }
  0x19   :  { %1444 = vmatpush3.bf16.msra.mxu1 %v223_v47 }
  0x1a   :  { %1455 = vmatprep.subr.bf16.mxu1 %v1600_v48 }
  0xd6   :  { %v1439_v10 = vpop.f32.mrf.mxu0 }
  0xd7   :  { %v108_v11 = vadd.f32 %v1439_v10, %v1375_v9 }
  0xd8   :  { %v99_v12 = vpop.f32.mrf.mxu0 }
  0xd9   :  { %v100_v13 = vadd.f32 %v1375_v9, %v99_v12  ;;  %v121_v14 = vsel %vm114_vm1, %v108_v11, 0.0 }
  0xda   :  { %122 = vadd.xlane.f32.xlu1 %v121_v14  ;;  %v1440_v15 = vpop.f32.mrf.mxu0 }
  0xdb   :  { %v111_v16 = vadd.f32 %v1440_v15, %v1375_v9  ;;  %v115_v17 = vsel %vm114_vm1, %v100_v13, 0.0 }
  0xdc   :  { %v102_v18 = vpop.f32.mrf.mxu0  ;;  %116 = vadd.xlane.f32.xlu0 %v115_v17 }
  0xdd   :  { %v103_v19 = vadd.f32 %v1375_v9, %v102_v18  ;;  %v124_v20 = vsel %vm114_vm1, %v111_v16, 0.0 }
  0xde   :  { %125 = vadd.xlane.f32.xlu1 %v124_v20 }
  0xdf   :  { %v118_v21 = vsel %vm114_vm1, %v103_v19, 0.0 }
  0xe0   :  { %119 = vadd.xlane.f32.xlu0 %v118_v21 }
 0x163   :  { %v123_v22 = vpop.xlane.xlu1 %122 }
 0x164   :  { %v130_v23 = vmul.f32 0.03125, %v123_v22 }
 0x165   :  { %v117_v24 = vpop.xlane.xlu0 %116 }
 0x166   :  { %v128_v25 = vmul.f32 0.03125, %v117_v24  ;;  %v134_v27 = vsub.f32 %v108_v11, %v130_v23 }
 0x167   :  { %v126_v26 = vpop.xlane.xlu1 %125 }
 0x168   :  { %v132_v28 = vsub.f32 %v100_v13, %v128_v25  ;;  %v131_v29 = vmul.f32 0.03125, %v126_v26  ;;  %v138_v36 = vmul.f32 %v134_v27, %v134_v27  ;;  %v190_v26 = vadd.s32 8, %v1691_v61 }
 0x169   :  { %v120_v30 = vpop.xlane.xlu0 %119 }
 0x16a   :  { %v129_v31 = vmul.f32 0.03125, %v120_v30  ;;  %v136_v32 = vmul.f32 %v132_v28, %v132_v28  ;;  %v135_v33 = vsub.f32 %v111_v16, %v131_v29  ;;  %v146_v38 = vsel %vm114_vm1, %v138_v36, 0.0 }
 0x16b   :  { %v192_v30 = vstv %s191_s29  ;;  %vm208_vm10 = vcmp.lt.s32.totalorder %v190_v26, 14 }
 0x16c   :  { %v133_v34 = vsub.f32 %v103_v19, %v129_v31  ;;  %v140_v35 = vsel %vm114_vm1, %v136_v32, 0.0  ;;  %v139_v40 = vmul.f32 %v135_v33, %v135_v33  ;;  %vm194_vm7 = vcmp.lt.s32.totalorder %v190_v26, %v192_v30 }
 0x16d   :  { %141 = vadd.xlane.f32.xlu0 %v140_v35  ;;  %vm193_vm8 = vcmp.lt.s32.totalorder %v1691_v61, %v192_v30 }
 0x16e   :  { %v137_v37 = vmul.f32 %v133_v34, %v133_v34  ;;  %v149_v41 = vsel %vm114_vm1, %v139_v40, 0.0  ;;  %v1751_v40 = vsel %vm194_vm7, 1.0, %v1600_v48  ;;  %v1765_v44 = vsel %vm193_vm8, 1.0, %v1600_v48 }
 0x170   :  { %v143_v39 = vsel %vm114_vm1, %v137_v37, 0.0 }
 0x171   :  { %147 = vadd.xlane.f32.xlu0 %v146_v38  ;;  %144 = vadd.xlane.f32.xlu1 %v143_v39 }
 0x175   :  { %150 = vadd.xlane.f32.xlu1 %v149_v41 }
 0x1f6   :  { %v142_v49 = vpop.xlane.xlu0 %141 }
 0x1f7   :  { %v152_v50 = vmul.f32 0.03125, %v142_v49 }
 0x1f9   :  { %v156_v51 = vadd.f32 1e-05, %v152_v50 }
 0x1fa   :  { %v145_v52 = vpop.xlane.xlu1 %144  ;;  %v148_v53 = vpop.xlane.xlu0 %147 }
 0x1fb   :  { %1539 = vrsqrt.f32 %v156_v51  ;;  %v153_v54 = vmul.f32 0.03125, %v145_v52  ;;  %v154_v55 = vmul.f32 0.03125, %v148_v53  ;;  %v1782_v51 = vsel %vm208_vm10, 1.0, %v1600_v48 }
 0x1fd   :  { %v157_v57 = vadd.f32 1e-05, %v153_v54  ;;  %v158_v58 = vadd.f32 1e-05, %v154_v55 }
 0x1fe   :  { %v151_v59 = vpop.xlane.xlu1 %150 }
 0x1ff   :  { %1541 = vrsqrt.f32 %v157_v57  ;;  %v155_v60 = vmul.f32 0.03125, %v151_v59 }
 0x200   :  { %1543 = vrsqrt.f32 %v158_v58 }
 0x201   :  { %v159_v62 = vadd.f32 1e-05, %v155_v60 }
 0x203   :  { %1545 = vrsqrt.f32 %v159_v62 }
 0x208   :  { %v1540_v2 = vpop.eup %1539 }
 0x209   :  { %v164_v4 = vmul.f32 %v1540_v2, %v132_v28 }
 0x20b   :  { %v172_v5 = vmul.f32 %v171_v1, %v164_v4 }
 0x20c   :  { %v1542_v7 = vpop.eup %1541 }
 0x20d   :  { %v1544_v8 = vpop.eup %1543  ;;  %v165_v9 = vmul.f32 %v1542_v7, %v133_v34  ;;  %v1706_v12 = vadd.f32 %v179_v6, %v172_v5 }
 0x20e   :  { %v166_v10 = vmul.f32 %v1544_v8, %v134_v27  ;;  %v200_v27 = vstv %s1380_s28 }
 0x20f   :  { %v173_v11 = vmul.f32 %v171_v1, %v165_v9  ;;  %v184_v17 = vmax.f32 %v1706_v12, 0.0  ;;  %vm202_vm2 = vcmp.lt.s32.totalorder %v190_v26, %v200_v27  ;;  %vm201_vm3 = vcmp.lt.s32.totalorder %v1691_v61, %v200_v27 }
 0x210   :  { %v1546_v13 = vpop.eup %1545  ;;  %v174_v14 = vmul.f32 %v171_v1, %v166_v10  ;;  %v1731_v31 = vsel %vm202_vm2, 1.0, %v1600_v48 }
 0x211   :  { %v1708_v15 = vadd.f32 %v179_v6, %v173_v11  ;;  %v167_v16 = vmul.f32 %v1546_v13, %v135_v33  ;;  %v1734_v33 = vsel %vm201_vm3, 1.0, %v1600_v48 }
 0x212   :  { %v1712_v20 = vadd.f32 %v179_v6, %v174_v14 }
 0x213   :  { %v185_v18 = vmax.f32 %v1708_v15, 0.0  ;;  %v175_v19 = vmul.f32 %v171_v1, %v167_v16 }
 0x214   :  { %v186_v23 = vmax.f32 %v1712_v20, 0.0 }
 0x215   :  { %v221_v21 = vpack.c.bf16 %v185_v18, %v184_v17  ;;  %v1718_v22 = vadd.f32 %v179_v6, %v175_v19 }
 0x217   :  { %1445 = vmatprep.mubr.msk.bf16.mxu1 %vm114_vm1, %v221_v21  ;;  %v187_v24 = vmax.f32 %v1718_v22, 0.0 }
 0x219   :  { %v222_v25 = vpack.c.bf16 %v187_v24, %v186_v23 }
 0x21b   :  { %1446 = vmatmul.mubr.msk.bf16.vlgmr.msra.gmra.mxu1 %vm114_vm1, %v222_v25 }
 0x21c   :  { %1459 = vmatprep.mubr.msk.bf16.mxu1 %vm1603_vm12, %v1600_v48 }
 0x2db   :  { %v1447_v28 = vpop.f32.mrf.mxu1 }
 0x2dc   :  { %vm282_vm4 = vcmp.eq.f32.partialorder %v1447_v28, 0.0  ;;  %v1756_v42 = vmul.f32 %v1447_v28, %v1734_v33 }
 0x2dd   :  { %v265_v29 = vpop.f32.mrf.mxu1  ;;  %v1736_v34 = vsel %vm282_vm4, 1e-06, %v1447_v28 }
 0x2de   :  { %vm280_vm5 = vcmp.eq.f32.partialorder %v265_v29, 0.0  ;;  %v1775_v47 = vmul.f32 %v1765_v44, %v265_v29  ;;  %v328_v60 = vmul.f32 %v1736_v34, %v1736_v34  ;;  %v685_v11 = vsel %vm512_vm11, %v1736_v34, 0.0 }
 0x2df   :  { %v1448_v32 = vpop.f32.mrf.mxu1  ;;  %v1748_v39 = vsel %vm280_vm5, 1e-06, %v265_v29 }
 0x2e0   :  { %vm283_vm6 = vcmp.eq.f32.partialorder %v1448_v32, 0.0  ;;  %v1742_v37 = vmul.f32 %v1448_v32, %v1731_v31  ;;  %v290_v59 = vmul.f32 %v1748_v39, %v1748_v39  ;;  %v330_v4 = vsel %vm114_vm1, %v328_v60, 0.0 }
 0x2e1   :  { %v1738_v35 = vsel %vm283_vm6, 1e-06, %v1448_v32  ;;  %v268_v36 = vpop.f32.mrf.mxu1  ;;  %v513_v29 = vsel %vm512_vm11, %v1748_v39, 0.0 }
 0x2e2   :  { %vm281_vm9 = vcmp.eq.f32.partialorder %v268_v36, 0.0  ;;  %v1746_v38 = vpack.c.bf16 %v1738_v35, %v1736_v34  ;;  %v1768_v45 = vmul.f32 %v1751_v40, %v268_v36  ;;  %v545_v46 = vpack.c.bf16 %v1742_v37, %v1756_v42 }
 0x2e3   :  { %v1753_v41 = vsel %vm281_vm9, 1e-06, %v268_v36  ;;  %v327_v55 = vmul.f32 %v1782_v51, %v1738_v35  ;;  %v292_v63 = vsel %vm114_vm1, %v290_v59, 0.0 }
 0x2e4   :  { %547 = vrot.lane.b32.xlu1 %v1746_v38, %s1601_s30  ;;  %v1762_v43 = vpack.c.bf16 %v1753_v41, %v1748_v39  ;;  %v371_v49 = vpack.c.bf16 %v1768_v45, %v1775_v47  ;;  %v289_v53 = vmul.f32 %v1782_v51, %v1753_v41 }
 0x2e5   :  { %v329_v58 = vmul.f32 %v327_v55, %v327_v55  ;;  %v686_v10 = vsel %vm512_vm11, %v327_v55, 0.0 }
 0x2e6   :  { %373 = vrot.lane.b32.xlu0 %v1762_v43, %s1601_s30  ;;  %v291_v56 = vmul.f32 %v289_v53, %v289_v53  ;;  %v687_v13 = vadd.f32 %v686_v10, %v685_v11  ;;  %v514_v21 = vsel %vm512_vm11, %v289_v53, 0.0 }
 0x2e7   :  { %v331_v2 = vsel %vm114_vm1, %v329_v58, 0.0  ;;  %v515_v32 = vadd.f32 %v514_v21, %v513_v29 }
 0x2e8   :  { %567 = vrot.lane.b32.xlu1 %v545_v46, %s1602_s8  ;;  %v293_v62 = vsel %vm114_vm1, %v291_v56, 0.0  ;;  %v332_v5 = vadd.f32 %v331_v2, %v330_v4  ;;  %v688_v16 = vrot.slane %v687_v13, 4 }
 0x2e9   :  { %v294_v1 = vadd.f32 %v293_v62, %v292_v63  ;;  %v516_v53 = vrot.slane %v515_v32, 4 }
 0x2ea   :  { %v689_v30 = vadd.f32 %v688_v16, %v687_v13 }
 0x2eb   :  { %v517_v55 = vadd.f32 %v516_v53, %v515_v32 }
 0x2ec   :  { %393 = vrot.lane.b32.xlu1 %v371_v49, %s1602_s8 }
 0x356   :  { %v548_v50 = vpop.permute.xlu1 %547 }
 0x357   :  { %550 = vxpose.xlu1.c.b16.start.end [1/1] (short) (narrow) %v548_v50, 32 }
 0x358   :  { %v374_v52 = vpop.permute.xlu0 %373 }
 0x359   :  { %376 = vxpose.xlu0.c.b16.start.end [1/1] (short) (narrow) %v374_v52, 32  ;;  %v690_v52 = vrot.slane %v689_v30, 2 }
 0x35a   :  { %v568_v54 = vpop.permute.xlu1 %567 }
 0x35e   :  { %v394_v57 = vpop.permute.xlu1 %393 }
 0x35f   :  { %1449 = vmatprep.subr.bf16.mxu0 %v394_v57  ;;  %309 = vrot.lane.b32.xlu1 %v291_v56, %s1601_s30 }
 0x360   :  { %1450 = vmatpush3.bf16.msra.mxu0 %v394_v57  ;;  %v518_v57 = vrot.slane %v517_v55, 2 }
 0x361   :  { %1463 = vmatprep.subr.bf16.mxu0 %v568_v54 }
 0x363   :  { %347 = vrot.lane.b32.xlu1 %v329_v58, %s1601_s30 }
 0x366   :  { %307 = vrot.lane.b32.xlu0 %v290_v59, %s1601_s30  ;;  %v519_v59 = vadd.f32 %v518_v57, %v517_v55 }
 0x36a   :  { %345 = vrot.lane.b32.xlu0 %v328_v60, %s1601_s30  ;;  %v520_v60 = vrot.slane %v519_v59, 1 }
 0x36c   :  { %v521_v62 = vadd.f32 %v520_v60, %v519_v59 }
 0x389   :  { %295 = vadd.xlane.f32.xlu0 %v294_v1 }
 0x38d   :  { %333 = vadd.xlane.f32.xlu0 %v332_v5 }
 0x3b9   :  { %v558_v7 = vpop.trf.xlu1 }
 0x3bb   :  { %v384_v6 = vpop.trf.xlu0 }
 0x3bc   :  { %1451 = vmatprep.mubr.msk.bf16.mxu0 %vm58_vm0, %v384_v6 }
 0x3bd   :  { %v559_v9 = vpop.trf.xlu1 }
 0x3bf   :  { %v385_v8 = vpop.trf.xlu0 }
 0x3c0   :  { %1452 = vmatmul.mubr.msk.bf16.vlgmr.msra.gmra.mxu0 %vm58_vm0, %v385_v8 }
 0x3c1   :  { %1464 = vmatpush3.bf16.msra.mxu0 %v568_v54  ;;  %1465 = vmatprep.mubr.msk.bf16.mxu0 %vm58_vm0, %v558_v7  ;;  %v691_v54 = vadd.f32 %v690_v52, %v689_v30 }
 0x3c3   :  { %v692_v56 = vrot.slane %v691_v54, 1 }
 0x3c5   :  { %v693_v58 = vadd.f32 %v692_v56, %v691_v54 }
 0x3c8   :  { %1466 = vmatmul.mubr.msk.bf16.vlgmr.msra.gmra.mxu0 %vm58_vm0, %v559_v9 }
 0x3d1   :  { %v310_v14 = vpop.permute.xlu1 %309 }
 0x3d2   :  { %v314_v25 = vsel %vm114_vm1, %v310_v14, 0.0 }
 0x3d5   :  { %v348_v27 = vpop.permute.xlu1 %347 }
 0x3d6   :  { %v352_v46 = vsel %vm114_vm1, %v348_v27, 0.0 }
 0x3d8   :  { %v308_v19 = vpop.permute.xlu0 %307 }
 0x3d9   :  { %v313_v26 = vsel %vm114_vm1, %v308_v19, 0.0 }
 0x3da   :  { %v315_v28 = vadd.f32 %v314_v25, %v313_v26 }
 0x3dc   :  { %v346_v36 = vpop.permute.xlu0 %345  ;;  %316 = vadd.xlane.f32.xlu1 %v315_v28 }
 0x3dd   :  { %v351_v49 = vsel %vm114_vm1, %v346_v36, 0.0 }
 0x3de   :  { %v353_v50 = vadd.f32 %v352_v46, %v351_v49 }
 0x3e0   :  { %354 = vadd.xlane.f32.xlu0 %v353_v50 }
 0x3ed   :  { %695 = vrot.lane.b32.xlu1 %v693_v58, %s1601_s30 }
 0x3f6   :  { %523 = vrot.lane.b32.xlu0 %v521_v62, %s1601_s30 }
 0x412   :  { %v296_v63 = vpop.xlane.xlu0 %295 }
 0x413   :  { %v297_v1 = vrot.slane %v296_v63, 4 }
 0x415   :  { %v298_v2 = vadd.f32 %v297_v1, %v296_v63  ;;  %v673_v1 = vmul.f32 14.0, %v1756_v42 }
 0x416   :  { %v334_v8 = vpop.xlane.xlu0 %333 }
 0x417   :  { %v299_v4 = vrot.slane %v298_v2, 2  ;;  %v335_v9 = vrot.slane %v334_v8, 4 }
 0x419   :  { %v300_v5 = vadd.f32 %v299_v4, %v298_v2  ;;  %v336_v10 = vadd.f32 %v335_v9, %v334_v8  ;;  %v500_v4 = vmul.f32 14.0, %v1775_v47 }
 0x41b   :  { %v301_v6 = vrot.slane %v300_v5, 1  ;;  %v337_v11 = vrot.slane %v336_v10, 2 }
 0x41d   :  { %v302_v7 = vadd.f32 %v301_v6, %v300_v5  ;;  %v338_v25 = vadd.f32 %v337_v11, %v336_v10 }
 0x41f   :  { %1513 = vpush %v302_v7  ;;  %v339_v50 = vrot.slane %v338_v25, 1 }
 0x421   :  { %v340_v58 = vadd.f32 %v339_v50, %v338_v25 }
 0x450   :  { %s1514_s9 = spop %1513 }
 0x465   :  { %v317_v13 = vpop.xlane.xlu1 %316 }
 0x466   :  { %v318_v14 = vrot.slane %v317_v13, 4 }
 0x468   :  { %v319_v16 = vadd.f32 %v318_v14, %v317_v13 }
 0x469   :  { %v696_v19 = vpop.permute.xlu1 %695  ;;  %v355_v21 = vpop.xlane.xlu0 %354 }
 0x46a   :  { %v320_v26 = vrot.slane %v319_v16, 2  ;;  %v698_v27 = vmul.f32 %v696_v19, %v1736_v34  ;;  %v699_v28 = vmul.f32 %v696_v19, %v1738_v35  ;;  %v356_v29 = vrot.slane %v355_v21, 4 }
 0x46c   :  { %v357_v30 = vadd.f32 %v356_v29, %v355_v21  ;;  %v703_v32 = vsel %vm114_vm1, %v699_v28, 0.0  ;;  %v700_v36 = vsel %vm114_vm1, %v698_v27, 0.0  ;;  %v321_v46 = vadd.f32 %v320_v26, %v319_v16 }
 0x46d   :  { %704 = vadd.xlane.f32.xlu1 %v703_v32  ;;  %701 = vadd.xlane.f32.xlu0 %v700_v36  ;;  %v524_v49 = vpop.permute.xlu0 %523 }
 0x46e   :  { %v358_v52 = vrot.slane %v357_v30, 2  ;;  %v526_v53 = vmul.f32 %v524_v49, %v1748_v39  ;;  %v527_v54 = vmul.f32 %v524_v49, %v1753_v41  ;;  %v322_v55 = vrot.slane %v321_v46, 1 }
 0x46f   :  { %v501_v39 = vmul.f32 14.0, %v1768_v45  ;;  %v674_v45 = vmul.f32 14.0, %v1742_v37 }
 0x470   :  { %v531_v34 = vsel %vm114_vm1, %v527_v54, 0.0  ;;  %v528_v35 = vsel %vm114_vm1, %v526_v53, 0.0  ;;  %v323_v56 = vadd.f32 %v322_v55, %v321_v46  ;;  %v359_v57 = vadd.f32 %v358_v52, %v357_v30 }
 0x471   :  { %532 = vadd.xlane.f32.xlu0 %v531_v34  ;;  %529 = vadd.xlane.f32.xlu1 %v528_v35 }
 0x472   :  { %1515 = vpush %v323_v56  ;;  %v360_v59 = vrot.slane %v359_v57, 1 }
 0x473   :  { %1517 = vpush %v340_v58 }
 0x474   :  { %v361_v60 = vadd.f32 %v360_v59, %v359_v57 }
 0x476   :  { %1519 = vpush %v361_v60 }
 0x480   :  { %v1453_v62 = vpop.f32.mrf.mxu0 }
 0x482   :  { %v436_v63 = vpop.f32.mrf.mxu0  ;;  %506 = vrot.lane.b32.xlu1 %v501_v39, %s1602_s8 }
 0x484   :  { %v1454_v41 = vpop.f32.mrf.mxu0 }
 0x485   :  { %v452_v2 = vpack.c.bf16 %v1454_v41, %v1453_v62 }
 0x486   :  { %v439_v5 = vpop.f32.mrf.mxu0  ;;  %677 = vrot.lane.b32.xlu1 %v673_v1, %s1602_s8 }
 0x487   :  { %1456 = vmatpush3.bf16.msra.mxu1 %v452_v2  ;;  %504 = vrot.lane.b32.xlu0 %v500_v4, %s1602_s8  ;;  %v451_v7 = vpack.c.bf16 %v439_v5, %v436_v63 }
 0x488   :  { %v1467_v6 = vpop.f32.mrf.mxu0  ;;  %1457 = vmatprep.subr.bf16.mxu1 %v1600_v48 }
 0x48a   :  { %v610_v8 = vpop.f32.mrf.mxu0  ;;  %679 = vrot.lane.b32.xlu1 %v674_v45, %s1602_s8 }
 0x48b   :  { %1458 = vmatpush3.bf16.msra.mxu1 %v451_v7 }
 0x48c   :  { %v1468_v42 = vpop.f32.mrf.mxu0  ;;  %1469 = vmatprep.subr.bf16.mxu1 %v1600_v48 }
 0x48d   :  { %v626_v47 = vpack.c.bf16 %v1468_v42, %v1467_v6 }
 0x48e   :  { %1460 = vmatmul.mubr.msk.bf16.vlgmr.msra.gmra.mxu1 %vm114_vm1, %v1762_v43  ;;  %v613_v9 = vpop.f32.mrf.mxu0 }
 0x48f   :  { %1470 = vmatpush3.bf16.msra.mxu1 %v626_v47  ;;  %1473 = vmatprep.mubr.msk.bf16.mxu1 %vm1603_vm12, %v1600_v48  ;;  %v625_v37 = vpack.c.bf16 %v613_v9, %v610_v8 }
 0x490   :  { %1471 = vmatprep.subr.bf16.mxu1 %v1600_v48 }
 0x493   :  { %1472 = vmatpush3.bf16.msra.mxu1 %v625_v37 }
 0x496   :  { %1474 = vmatmul.mubr.msk.bf16.vlgmr.msra.gmra.mxu1 %vm114_vm1, %v1746_v38 }
 0x4a3   :  { %s1516_s0 = spop %1515 }
 0x4a4   :  { %s1518_s10 = spop %1517 }
 0x4a5   :  { %s342_s11 = sadd.f32 %s1518_s10, %s1514_s9 }
 0x4a7   :  { %s1520_s12 = spop %1519 }
 0x4a8   :  { %s363_s13 = sadd.f32 %s1520_s12, %s1516_s0 }
 0x4aa   :  { %s364_s14 = smul.f32 %s363_s13, %s342_s11 }
 0x4ac   :  { %v365_v43 = vstv %s364_s14 }
 0x4ad   :  { %1547 = vrsqrt.f32 %v365_v43 }
 0x4ba   :  { %v1548_v10 = vpop.eup %1547 }
 0x4bb   :  { %1521 = vpush %v1548_v10 }
 0x4ec   :  { %s1522_s15 = spop %1521 }
 0x4ed   :  { %v497_v16 = vstv %s1522_s15 }
 0x4f6   :  { %v705_v11 = vpop.xlane.xlu1 %704  ;;  %v702_v13 = vpop.xlane.xlu0 %701 }
 0x4f7   :  { %v706_v26 = vmul.f32 %v702_v13, %v497_v16  ;;  %v707_v28 = vmul.f32 %v705_v11, %v497_v16 }
 0x4f9   :  { %v708_v29 = vadd.f32 14.0, %v706_v26  ;;  %v709_v30 = vadd.f32 14.0, %v707_v28 }
 0x4fa   :  { %v530_v14 = vpop.xlane.xlu1 %529  ;;  %v533_v21 = vpop.xlane.xlu0 %532 }
 0x4fb   :  { %v534_v19 = vmul.f32 %v530_v14, %v497_v16  ;;  %v535_v38 = vmul.f32 %v533_v21, %v497_v16 }
 0x4fd   :  { %v536_v25 = vadd.f32 14.0, %v534_v19  ;;  %v537_v27 = vadd.f32 14.0, %v535_v38 }
 0x4fe   :  { %v507_v36 = vpop.permute.xlu1 %506  ;;  %v505_v49 = vpop.permute.xlu0 %504 }
 0x4ff   :  { %1549 = vrcp.f32 %v536_v25 }
 0x500   :  { %1551 = vrcp.f32 %v537_v27 }
 0x501   :  { %1553 = vrcp.f32 %v708_v29 }
 0x502   :  { %1555 = vrcp.f32 %v709_v30  ;;  %v678_v59 = vpop.permute.xlu1 %677 }
 0x50c   :  { %v1550_v53 = vpop.eup %1549 }
 0x50d   :  { %v1552_v58 = vpop.eup %1551 }
 0x50e   :  { %v1554_v5 = vpop.eup %1553 }
 0x50f   :  { %v1556_v37 = vpop.eup %1555 }
 0x54e   :  { %v490_v32 = vpop.f32.mrf.mxu1 }
 0x54f   :  { %v498_v46 = vmul.f32 %v497_v16, %v490_v32 }
 0x550   :  { %v1461_v50 = vpop.f32.mrf.mxu1 }
 0x551   :  { %v510_v52 = vadd.f32 %v505_v49, %v498_v46 }
 0x552   :  { %v493_v54 = vpop.f32.mrf.mxu1 }
 0x553   :  { %v539_v55 = vmul.f32 %v1550_v53, %v510_v52  ;;  %v499_v34 = vmul.f32 %v497_v16, %v493_v54  ;;  %v219_v52 = vld [vmem:[%s2039_s6 + $0x30] sm:$0xff]  ;;  %v220_v53 = vld [vmem:[%s2039_s6 + $0x38] sm:$0xff] }
 0x554   :  { %v1462_v35 = vpop.f32.mrf.mxu1  ;;  %v797_v54 = vpack.c.bf16 %v220_v53, %v219_v52 }
 0x555   :  { %v511_v56 = vadd.f32 %v507_v36, %v499_v34  ;;  %v714_v57 = vadd.f32 %v539_v55, %v184_v17  ;;  %v680_v17 = vpop.permute.xlu1 %679  ;;  %v217_v55 = vld [vmem:[%s2039_s6 + $0x20] sm:$0xff]  ;;  %v218_v34 = vld [vmem:[%s2039_s6 + $0x28] sm:$0xff] }
 0x556   :  { %v664_v60 = vpop.f32.mrf.mxu1  ;;  %1477 = vmatprep.subr.bf16.mxu0 %v797_v54  ;;  %v796_v35 = vpack.c.bf16 %v218_v34, %v217_v55 }
 0x557   :  { %v541_v62 = vmul.f32 %v1552_v58, %v511_v56  ;;  %v671_v39 = vmul.f32 %v664_v60, %v497_v16  ;;  %v718_v63 = vmul.f32 0.5, %v714_v57  ;;  %1478 = vmatpush3.bf16.msra.mxu0 %v797_v54 }
 0x558   :  { %v1475_v41 = vpop.f32.mrf.mxu1  ;;  %1479 = vmatprep.subr.bf16.mxu0 %v796_v35 }
 0x559   :  { %v683_v1 = vadd.f32 %v678_v59, %v671_v39  ;;  %v722_v2 = vsel %vm114_vm1, %v718_v63, 0.0  ;;  %v715_v4 = vadd.f32 %v541_v62, %v185_v18 }
 0x55a   :  { %v667_v6 = vpop.f32.mrf.mxu1  ;;  %723 = vadd.xlane.f32.xlu0 %v722_v2  ;;  %v776_v2 = vsub.s32 1, %v1691_v61 }
 0x55b   :  { %v711_v45 = vmul.f32 %v1554_v5, %v683_v1  ;;  %v672_v7 = vmul.f32 %v667_v6, %v497_v16  ;;  %v719_v12 = vmul.f32 0.5, %v715_v4  ;;  %1480 = vmatpush3.bf16.msra.mxu0 %v796_v35 }
 0x55c   :  { %v1476_v8 = vpop.f32.mrf.mxu1  ;;  %1491 = vmatprep.subr.bf16.mxu0 %v1600_v48  ;;  %v777_v6 = vrot.slane %v1697_v0, %v776_v2 }
 0x55d   :  { %v684_v42 = vadd.f32 %v680_v17, %v672_v7  ;;  %v725_v47 = vsel %vm114_vm1, %v719_v12, 0.0  ;;  %v716_v9 = vadd.f32 %v711_v45, %v186_v23  ;;  %v785_v7 = vrot.slane %v1703_v3, %v776_v2 }
 0x55e   :  { %726 = vadd.xlane.f32.xlu1 %v725_v47 }
 0x55f   :  { %v713_v43 = vmul.f32 %v1556_v37, %v684_v42  ;;  %v720_v10 = vmul.f32 0.5, %v716_v9 }
 0x561   :  { %v728_v15 = vsel %vm114_vm1, %v720_v10, 0.0  ;;  %v717_v18 = vadd.f32 %v713_v43, %v187_v24 }
 0x562   :  { %729 = vadd.xlane.f32.xlu0 %v728_v15 }
 0x563   :  { %v721_v11 = vmul.f32 0.5, %v717_v18 }
 0x565   :  { %v731_v13 = vsel %vm114_vm1, %v721_v11, 0.0 }
 0x566   :  { %732 = vadd.xlane.f32.xlu0 %v731_v13 }
 0x5e3   :  { %v724_v14 = vpop.xlane.xlu0 %723 }
 0x5e4   :  { %v734_v16 = vmul.f32 0.03125, %v724_v14 }
 0x5e6   :  { %v738_v19 = vsub.f32 %v718_v63, %v734_v16 }
 0x5e7   :  { %v727_v21 = vpop.xlane.xlu1 %726 }
 0x5e8   :  { %v735_v20 = vmul.f32 0.03125, %v727_v21  ;;  %v742_v23 = vmul.f32 %v738_v19, %v738_v19 }
 0x5ea   :  { %v739_v25 = vsub.f32 %v719_v12, %v735_v20  ;;  %v746_v38 = vsel %vm114_vm1, %v742_v23, 0.0 }
 0x5eb   :  { %747 = vadd.xlane.f32.xlu0 %v746_v38  ;;  %v730_v26 = vpop.xlane.xlu0 %729 }
 0x5ec   :  { %v736_v27 = vmul.f32 0.03125, %v730_v26  ;;  %v743_v28 = vmul.f32 %v739_v25, %v739_v25 }
 0x5ee   :  { %v740_v22 = vsub.f32 %v720_v10, %v736_v27  ;;  %v749_v24 = vsel %vm114_vm1, %v743_v28, 0.0 }
 0x5ef   :  { %750 = vadd.xlane.f32.xlu1 %v749_v24  ;;  %v733_v29 = vpop.xlane.xlu0 %732 }
 0x5f0   :  { %v737_v30 = vmul.f32 0.03125, %v733_v29  ;;  %v744_v32 = vmul.f32 %v740_v22, %v740_v22 }
 0x5f2   :  { %v741_v36 = vsub.f32 %v721_v11, %v737_v30  ;;  %v752_v46 = vsel %vm114_vm1, %v744_v32, 0.0 }
 0x5f3   :  { %753 = vadd.xlane.f32.xlu0 %v752_v46 }
 0x5f4   :  { %v745_v49 = vmul.f32 %v741_v36, %v741_v36 }
 0x5f6   :  { %v755_v50 = vsel %vm114_vm1, %v745_v49, 0.0 }
 0x5f7   :  { %756 = vadd.xlane.f32.xlu1 %v755_v50 }
 0x674   :  { %v748_v56 = vpop.xlane.xlu0 %747 }
 0x675   :  { %v758_v57 = vmul.f32 0.03125, %v748_v56 }
 0x677   :  { %v762_v58 = vadd.f32 1e-05, %v758_v57 }
 0x678   :  { %v751_v59 = vpop.xlane.xlu1 %750 }
 0x679   :  { %1557 = vrsqrt.f32 %v762_v58  ;;  %v759_v60 = vmul.f32 0.03125, %v751_v59 }
 0x67b   :  { %v763_v62 = vadd.f32 1e-05, %v759_v60 }
 0x67c   :  { %v754_v39 = vpop.xlane.xlu0 %753 }
 0x67d   :  { %1559 = vrsqrt.f32 %v763_v62  ;;  %v760_v63 = vmul.f32 0.03125, %v754_v39 }
 0x67f   :  { %v764_v41 = vadd.f32 1e-05, %v760_v63 }
 0x680   :  { %v757_v1 = vpop.xlane.xlu1 %756 }
 0x681   :  { %1561 = vrsqrt.f32 %v764_v41  ;;  %v761_v4 = vmul.f32 0.03125, %v757_v1 }
 0x683   :  { %v765_v5 = vadd.f32 1e-05, %v761_v4 }
 0x685   :  { %1563 = vrsqrt.f32 %v765_v5 }
 0x686   :  { %v1558_v45 = vpop.eup %1557 }
 0x687   :  { %v770_v12 = vmul.f32 %v1558_v45, %v738_v19 }
 0x689   :  { %v778_v17 = vmul.f32 %v777_v6, %v770_v12 }
 0x68a   :  { %v1560_v8 = vpop.eup %1559 }
 0x68b   :  { %v771_v42 = vmul.f32 %v1560_v8, %v739_v25  ;;  %v1875_v47 = vadd.f32 %v785_v7, %v778_v17 }
 0x68d   :  { %v779_v9 = vmul.f32 %v777_v6, %v771_v42  ;;  %v790_v15 = vmax.f32 %v1875_v47, 0.0 }
 0x68e   :  { %v1562_v37 = vpop.eup %1561 }
 0x68f   :  { %v772_v43 = vmul.f32 %v1562_v37, %v740_v22  ;;  %v1877_v10 = vadd.f32 %v785_v7, %v779_v9 }
 0x691   :  { %v791_v18 = vmax.f32 %v1877_v10, 0.0  ;;  %v780_v0 = vmul.f32 %v777_v6, %v772_v43 }
 0x692   :  { %v1564_v11 = vpop.eup %1563 }
 0x693   :  { %v773_v13 = vmul.f32 %v1564_v11, %v741_v36  ;;  %v794_v3 = vpack.c.bf16 %v791_v18, %v790_v15  ;;  %v1885_v14 = vadd.f32 %v785_v7, %v780_v0 }
 0x695   :  { %1481 = vmatprep.mubr.msk.bf16.mxu0 %vm114_vm1, %v794_v3  ;;  %v781_v16 = vmul.f32 %v777_v6, %v773_v13  ;;  %v792_v21 = vmax.f32 %v1885_v14, 0.0 }
 0x697   :  { %v1888_v19 = vadd.f32 %v785_v7, %v781_v16 }
 0x699   :  { %v793_v20 = vmax.f32 %v1888_v19, 0.0 }
 0x69b   :  { %v795_v23 = vpack.c.bf16 %v793_v20, %v792_v21 }
 0x69d   :  { %1482 = vmatmul.mubr.msk.bf16.vlgmr.msra.gmra.mxu0 %vm114_vm1, %v795_v23 }
 0x69e   :  { %1495 = vmatprep.mubr.msk.bf16.mxu0 %vm1603_vm12, %v1600_v48 }
 0x75d   :  { %v1483_v25 = vpop.f32.mrf.mxu0 }
 0x75e   :  { %vm855_vm13 = vcmp.eq.f32.partialorder %v1483_v25, 0.0  ;;  %v1915_v36 = vmul.f32 %v1483_v25, %v1734_v33 }
 0x75f   :  { %v838_v38 = vpop.f32.mrf.mxu0  ;;  %v1899_v27 = vsel %vm855_vm13, 1e-06, %v1483_v25 }
 0x760   :  { %vm853_vm14 = vcmp.eq.f32.partialorder %v838_v38, 0.0  ;;  %v1931_v50 = vmul.f32 %v1765_v44, %v838_v38  ;;  %v901_v57 = vmul.f32 %v1899_v27, %v1899_v27  ;;  %v1257_v5 = vsel %vm512_vm11, %v1899_v27, 0.0 }
 0x761   :  { %v1484_v26 = vpop.f32.mrf.mxu0  ;;  %v1910_v30 = vsel %vm853_vm14, 1e-06, %v838_v38 }
 0x762   :  { %vm856_vm15 = vcmp.eq.f32.partialorder %v1484_v26, 0.0  ;;  %v1904_v24 = vmul.f32 %v1484_v26, %v1731_v31  ;;  %v863_v56 = vmul.f32 %v1910_v30, %v1910_v30  ;;  %v903_v62 = vsel %vm114_vm1, %v901_v57, 0.0 }
 0x763   :  { %v1901_v28 = vsel %vm856_vm15, 1e-06, %v1484_v26  ;;  %v841_v22 = vpop.f32.mrf.mxu0  ;;  %v1085_v43 = vsel %vm512_vm11, %v1910_v30, 0.0 }
 0x764   :  { %vm854_vm2 = vcmp.eq.f32.partialorder %v841_v22, 0.0  ;;  %v1908_v29 = vpack.c.bf16 %v1901_v28, %v1899_v27  ;;  %v1924_v31 = vmul.f32 %v1751_v40, %v841_v22  ;;  %v1117_v49 = vpack.c.bf16 %v1904_v24, %v1915_v36 }
 0x765   :  { %v1912_v32 = vsel %vm854_vm2, 1e-06, %v841_v22  ;;  %v900_v55 = vmul.f32 %v1782_v51, %v1901_v28  ;;  %v865_v58 = vsel %vm114_vm1, %v863_v56, 0.0 }
 0x766   :  { %1119 = vrot.lane.b32.xlu1 %v1908_v29, %s1601_s30  ;;  %v1921_v46 = vpack.c.bf16 %v1912_v32, %v1910_v30  ;;  %v944_v33 = vpack.c.bf16 %v1924_v31, %v1931_v50  ;;  %v862_v53 = vmul.f32 %v1782_v51, %v1912_v32 }
 0x767   :  { %v902_v35 = vmul.f32 %v900_v55, %v900_v55  ;;  %v1258_v4 = vsel %vm512_vm11, %v900_v55, 0.0 }
 0x768   :  { %946 = vrot.lane.b32.xlu0 %v1921_v46, %s1601_s30  ;;  %v864_v44 = vmul.f32 %v862_v53, %v862_v53  ;;  %v1259_v6 = vadd.f32 %v1258_v4, %v1257_v5  ;;  %v1086_v17 = vsel %vm512_vm11, %v862_v53, 0.0 }
 0x769   :  { %v904_v60 = vsel %vm114_vm1, %v902_v35, 0.0  ;;  %v1087_v11 = vadd.f32 %v1086_v17, %v1085_v43 }
 0x76a   :  { %1139 = vrot.lane.b32.xlu1 %v1117_v49, %s1602_s8  ;;  %v866_v51 = vsel %vm114_vm1, %v864_v44, 0.0  ;;  %v905_v39 = vadd.f32 %v904_v60, %v903_v62  ;;  %v1260_v7 = vrot.slane %v1259_v6, 4 }
 0x76b   :  { %v867_v59 = vadd.f32 %v866_v51, %v865_v58  ;;  %v1088_v38 = vrot.slane %v1087_v11, 4 }
 0x76c   :  { %v1261_v0 = vadd.f32 %v1260_v7, %v1259_v6 }
 0x76d   :  { %v1089_v22 = vadd.f32 %v1088_v38, %v1087_v11 }
 0x76e   :  { %966 = vrot.lane.b32.xlu1 %v944_v33, %s1602_s8  ;;  %v1262_v25 = vrot.slane %v1261_v0, 2 }
 0x76f   :  { %v1090_v33 = vrot.slane %v1089_v22, 2 }
 0x770   :  { %v1263_v26 = vadd.f32 %v1262_v25, %v1261_v0 }
 0x772   :  { %v1264_v49 = vrot.slane %v1263_v26, 1 }
 0x7d8   :  { %v1120_v52 = vpop.permute.xlu1 %1119 }
 0x7d9   :  { %1122 = vxpose.xlu1.c.b16.start.end [1/1] (short) (narrow) %v1120_v52, 32  ;;  %v1265_v52 = vadd.f32 %v1264_v49, %v1263_v26  ;;  %v1245_v49 = vmul.f32 14.0, %v1915_v36 }
 0x7da   :  { %v947_v40 = vpop.permute.xlu0 %946 }
 0x7db   :  { %949 = vxpose.xlu0.c.b16.start.end [1/1] (short) (narrow) %v947_v40, 32  ;;  %v1091_v40 = vadd.f32 %v1090_v33, %v1089_v22 }
 0x7dc   :  { %v1140_v54 = vpop.permute.xlu1 %1139 }
 0x7dd   :  { %v1092_v53 = vrot.slane %v1091_v40, 1 }
 0x7e0   :  { %v967_v34 = vpop.permute.xlu1 %966 }
 0x7e1   :  { %1485 = vmatprep.subr.bf16.mxu1 %v967_v34  ;;  %882 = vrot.lane.b32.xlu1 %v864_v44, %s1601_s30 }
 0x7e2   :  { %1486 = vmatpush3.bf16.msra.mxu1 %v967_v34 }
 0x7e3   :  { %1499 = vmatprep.subr.bf16.mxu1 %v1140_v54 }
 0x7e5   :  { %920 = vrot.lane.b32.xlu1 %v902_v35, %s1601_s30 }
 0x7e8   :  { %880 = vrot.lane.b32.xlu0 %v863_v56, %s1601_s30 }
 0x7ec   :  { %918 = vrot.lane.b32.xlu0 %v901_v57, %s1601_s30 }
 0x80b   :  { %868 = vadd.xlane.f32.xlu0 %v867_v59 }
 0x80f   :  { %906 = vadd.xlane.f32.xlu0 %v905_v39 }
 0x83b   :  { %v1130_v41 = vpop.trf.xlu1 }
 0x83d   :  { %v957_v63 = vpop.trf.xlu0 }
 0x83e   :  { %1487 = vmatprep.mubr.msk.bf16.mxu1 %vm58_vm0, %v957_v63 }
 0x83f   :  { %v1131_v2 = vpop.trf.xlu1 }
 0x841   :  { %v958_v1 = vpop.trf.xlu0 }
 0x842   :  { %1488 = vmatmul.mubr.msk.bf16.vlgmr.msra.gmra.mxu1 %vm58_vm0, %v958_v1 }
 0x843   :  { %1500 = vmatpush3.bf16.msra.mxu1 %v1140_v54  ;;  %1501 = vmatprep.mubr.msk.bf16.mxu1 %vm58_vm0, %v1130_v41  ;;  %v1093_v54 = vadd.f32 %v1092_v53, %v1091_v40 }
 0x84a   :  { %1502 = vmatmul.mubr.msk.bf16.vlgmr.msra.gmra.mxu1 %vm58_vm0, %v1131_v2 }
 0x853   :  { %v883_v45 = vpop.permute.xlu1 %882 }
 0x854   :  { %v887_v8 = vsel %vm114_vm1, %v883_v45, 0.0 }
 0x857   :  { %v921_v9 = vpop.permute.xlu1 %920 }
 0x858   :  { %v925_v3 = vsel %vm114_vm1, %v921_v9, 0.0 }
 0x85a   :  { %v881_v12 = vpop.permute.xlu0 %880 }
 0x85b   :  { %v886_v42 = vsel %vm114_vm1, %v881_v12, 0.0 }
 0x85c   :  { %v888_v37 = vadd.f32 %v887_v8, %v886_v42 }
 0x85e   :  { %v919_v13 = vpop.permute.xlu0 %918  ;;  %889 = vadd.xlane.f32.xlu1 %v888_v37 }
 0x85f   :  { %v924_v16 = vsel %vm114_vm1, %v919_v13, 0.0 }
 0x860   :  { %v926_v23 = vadd.f32 %v925_v3, %v924_v16 }
 0x862   :  { %927 = vadd.xlane.f32.xlu0 %v926_v23 }
 0x86f   :  { %1267 = vrot.lane.b32.xlu1 %v1265_v52, %s1601_s30  ;;  %v1073_v52 = vmul.f32 14.0, %v1931_v50 }
 0x878   :  { %1095 = vrot.lane.b32.xlu0 %v1093_v54, %s1601_s30 }
 0x894   :  { %v869_v55 = vpop.xlane.xlu0 %868 }
 0x895   :  { %v870_v44 = vrot.slane %v869_v55, 4 }
 0x897   :  { %v871_v34 = vadd.f32 %v870_v44, %v869_v55 }
 0x898   :  { %v907_v58 = vpop.xlane.xlu0 %906 }
 0x899   :  { %v872_v35 = vrot.slane %v871_v34, 2  ;;  %v908_v59 = vrot.slane %v907_v58, 4 }
 0x89b   :  { %v873_v56 = vadd.f32 %v872_v35, %v871_v34  ;;  %v909_v60 = vadd.f32 %v908_v59, %v907_v58 }
 0x89d   :  { %v874_v57 = vrot.slane %v873_v56, 1  ;;  %v910_v62 = vrot.slane %v909_v60, 2 }
 0x89f   :  { %v875_v51 = vadd.f32 %v874_v57, %v873_v56  ;;  %v911_v4 = vadd.f32 %v910_v62, %v909_v60 }
 0x8a1   :  { %1523 = vpush %v875_v51  ;;  %v912_v37 = vrot.slane %v911_v4, 1 }
 0x8a3   :  { %v913_v23 = vadd.f32 %v912_v37, %v911_v4 }
 0x8d2   :  { %s1524_s6 = spop %1523 }
 0x8e7   :  { %v890_v39 = vpop.xlane.xlu1 %889 }
 0x8e8   :  { %v891_v63 = vrot.slane %v890_v39, 4 }
 0x8ea   :  { %v892_v41 = vadd.f32 %v891_v63, %v890_v39 }
 0x8eb   :  { %v1268_v1 = vpop.permute.xlu1 %1267  ;;  %v928_v2 = vpop.xlane.xlu0 %927 }
 0x8ec   :  { %v893_v5 = vrot.slane %v892_v41, 2  ;;  %v1270_v6 = vmul.f32 %v1268_v1, %v1899_v27  ;;  %v1271_v45 = vmul.f32 %v1268_v1, %v1901_v28  ;;  %v929_v7 = vrot.slane %v928_v2, 4 }
 0x8ee   :  { %v930_v12 = vadd.f32 %v929_v7, %v928_v2  ;;  %v1275_v17 = vsel %vm114_vm1, %v1271_v45, 0.0  ;;  %v1272_v8 = vsel %vm114_vm1, %v1270_v6, 0.0  ;;  %v894_v42 = vadd.f32 %v893_v5, %v892_v41 }
 0x8ef   :  { %1276 = vadd.xlane.f32.xlu1 %v1275_v17  ;;  %1273 = vadd.xlane.f32.xlu0 %v1272_v8  ;;  %v1096_v9 = vpop.permute.xlu0 %1095 }
 0x8f0   :  { %v931_v43 = vrot.slane %v930_v12, 2  ;;  %v1098_v0 = vmul.f32 %v1096_v9, %v1910_v30  ;;  %v1099_v11 = vmul.f32 %v1096_v9, %v1912_v32  ;;  %v895_v13 = vrot.slane %v894_v42, 1 }
 0x8f1   :  { %v1074_v30 = vmul.f32 14.0, %v1924_v31  ;;  %v1246_v31 = vmul.f32 14.0, %v1904_v24 }
 0x8f2   :  { %v1103_v27 = vsel %vm114_vm1, %v1099_v11, 0.0  ;;  %v1100_v28 = vsel %vm114_vm1, %v1098_v0, 0.0  ;;  %v896_v3 = vadd.f32 %v895_v13, %v894_v42  ;;  %v932_v16 = vadd.f32 %v931_v43, %v930_v12 }
 0x8f3   :  { %1104 = vadd.xlane.f32.xlu0 %v1103_v27  ;;  %1101 = vadd.xlane.f32.xlu1 %v1100_v28 }
 0x8f4   :  { %1525 = vpush %v896_v3  ;;  %v933_v25 = vrot.slane %v932_v16, 1 }
 0x8f5   :  { %1527 = vpush %v913_v23 }
 0x8f6   :  { %v934_v38 = vadd.f32 %v933_v25, %v932_v16 }
 0x8f8   :  { %1529 = vpush %v934_v38 }
 0x902   :  { %v1489_v26 = vpop.f32.mrf.mxu1 }
 0x904   :  { %v1009_v22 = vpop.f32.mrf.mxu1  ;;  %1079 = vrot.lane.b32.xlu1 %v1074_v30, %s1602_s8 }
 0x906   :  { %v1490_v32 = vpop.f32.mrf.mxu1 }
 0x907   :  { %v1025_v33 = vpack.c.bf16 %v1490_v32, %v1489_v26 }
 0x908   :  { %v1012_v40 = vpop.f32.mrf.mxu1  ;;  %1249 = vrot.lane.b32.xlu1 %v1245_v49, %s1602_s8 }
 0x909   :  { %1492 = vmatpush3.bf16.msra.mxu0 %v1025_v33  ;;  %1077 = vrot.lane.b32.xlu0 %v1073_v52, %s1602_s8  ;;  %v1024_v54 = vpack.c.bf16 %v1012_v40, %v1009_v22 }
 0x90a   :  { %v1503_v53 = vpop.f32.mrf.mxu1  ;;  %1493 = vmatprep.subr.bf16.mxu0 %v1600_v48 }
 0x90c   :  { %v1182_v55 = vpop.f32.mrf.mxu1  ;;  %1251 = vrot.lane.b32.xlu1 %v1246_v31, %s1602_s8 }
 0x90d   :  { %1494 = vmatpush3.bf16.msra.mxu0 %v1024_v54 }
 0x90e   :  { %v1504_v36 = vpop.f32.mrf.mxu1  ;;  %1505 = vmatprep.subr.bf16.mxu0 %v1600_v48 }
 0x90f   :  { %v1198_v50 = vpack.c.bf16 %v1504_v36, %v1503_v53 }
 0x910   :  { %1496 = vmatmul.mubr.msk.bf16.vlgmr.msra.gmra.mxu0 %vm114_vm1, %v1921_v46  ;;  %v1185_v44 = vpop.f32.mrf.mxu1 }
 0x911   :  { %1506 = vmatpush3.bf16.msra.mxu0 %v1198_v50  ;;  %1509 = vmatprep.mubr.msk.bf16.mxu0 %vm1603_vm12, %v1600_v48  ;;  %v1197_v24 = vpack.c.bf16 %v1185_v44, %v1182_v55 }
 0x912   :  { %1507 = vmatprep.subr.bf16.mxu0 %v1600_v48 }
 0x915   :  { %1508 = vmatpush3.bf16.msra.mxu0 %v1197_v24 }
 0x918   :  { %1510 = vmatmul.mubr.msk.bf16.vlgmr.msra.gmra.mxu0 %vm114_vm1, %v1908_v29 }
 0x925   :  { %s1526_s21 = spop %1525 }
 0x926   :  { %s1528_s22 = spop %1527 }
 0x927   :  { %s915_s23 = sadd.f32 %s1528_s22, %s1524_s6 }
 0x929   :  { %s1530_s24 = spop %1529 }
 0x92a   :  { %s936_s25 = sadd.f32 %s1530_s24, %s1526_s21 }
 0x92c   :  { %s937_s26 = smul.f32 %s936_s25, %s915_s23 }
 0x92e   :  { %v938_v46 = vstv %s937_s26 }
 0x92f   :  { %1565 = vrsqrt.f32 %v938_v46 }
 0x93c   :  { %v1566_v34 = vpop.eup %1565 }
 0x93d   :  { %1531 = vpush %v1566_v34 }
 0x96e   :  { %s1532_s27 = spop %1531 }
 0x96f   :  { %v1070_v57 = vstv %s1532_s27 }
 0x978   :  { %v1277_v35 = vpop.xlane.xlu1 %1276  ;;  %v1274_v56 = vpop.xlane.xlu0 %1273 }
 0x979   :  { %v1278_v60 = vmul.f32 %v1274_v56, %v1070_v57  ;;  %v1279_v39 = vmul.f32 %v1277_v35, %v1070_v57 }
 0x97b   :  { %v1280_v63 = vadd.f32 14.0, %v1278_v60  ;;  %v1281_v41 = vadd.f32 14.0, %v1279_v39 }
 0x97c   :  { %v1102_v48 = vpop.xlane.xlu1 %1101  ;;  %v1105_v58 = vpop.xlane.xlu0 %1104 }
 0x97d   :  { %v1106_v51 = vmul.f32 %v1102_v48, %v1070_v57  ;;  %v1107_v29 = vmul.f32 %v1105_v58, %v1070_v57 }
 0x97f   :  { %v1108_v59 = vadd.f32 14.0, %v1106_v51  ;;  %v1109_v62 = vadd.f32 14.0, %v1107_v29 }
 0x980   :  { %v1080_v2 = vpop.permute.xlu1 %1079  ;;  %v1078_v5 = vpop.permute.xlu0 %1077 }
 0x981   :  { %1567 = vrcp.f32 %v1108_v59 }
 0x982   :  { %1569 = vrcp.f32 %v1109_v62 }
 0x983   :  { %1571 = vrcp.f32 %v1280_v63 }
 0x984   :  { %1573 = vrcp.f32 %v1281_v41  ;;  %v1250_v0 = vpop.permute.xlu1 %1249 }
 0x98e   :  { %v1568_v7 = vpop.eup %1567 }
 0x98f   :  { %v1570_v43 = vpop.eup %1569 }
 0x990   :  { %v1572_v38 = vpop.eup %1571 }
 0x991   :  { %v1574_v40 = vpop.eup %1573 }
 0x9d0   :  { %v1063_v1 = vpop.f32.mrf.mxu0 }
 0x9d1   :  { %v1071_v4 = vmul.f32 %v1070_v57, %v1063_v1 }
 0x9d2   :  { %v1497_v6 = vpop.f32.mrf.mxu0 }
 0x9d3   :  { %v1083_v45 = vadd.f32 %v1078_v5, %v1071_v4 }
 0x9d4   :  { %v1066_v12 = vpop.f32.mrf.mxu0 }
 0x9d5   :  { %v1111_v17 = vmul.f32 %v1568_v7, %v1083_v45  ;;  %v1072_v8 = vmul.f32 %v1070_v57, %v1066_v12  ;;  %v1348_v12 = vsub.s32 2, %v1691_v61 }
 0x9d6   :  { %v1498_v42 = vpop.f32.mrf.mxu0 }
 0x9d7   :  { %v1084_v9 = vadd.f32 %v1080_v2, %v1072_v8  ;;  %v1286_v37 = vadd.f32 %v1111_v17, %v790_v15  ;;  %v1252_v15 = vpop.permute.xlu1 %1251  ;;  %v1583_v42 = vld [vmem:[%s2037_s4] sm:$0x7] }
 0x9d8   :  { %v1236_v11 = vpop.f32.mrf.mxu0 }
 0x9d9   :  { %v1113_v13 = vmul.f32 %v1570_v43, %v1084_v9  ;;  %v1243_v27 = vmul.f32 %v1236_v11, %v1070_v57  ;;  %v1290_v28 = vmul.f32 0.5, %v1286_v37  ;;  %v1349_v9 = vrot.slane %v1583_v42, %v1348_v12  ;;  %v1584_v43 = vld [vmem:[%s2038_s5] sm:$0x7] }
 0x9da   :  { %v1511_v3 = vpop.f32.mrf.mxu0 }
 0x9db   :  { %v1255_v16 = vadd.f32 %v1250_v0, %v1243_v27  ;;  %v1294_v23 = vsel %vm114_vm1, %v1290_v28, 0.0  ;;  %v1287_v25 = vadd.f32 %v1113_v13, %v791_v18  ;;  %v1357_v0 = vrot.slane %v1584_v43, %v1348_v12 }
 0x9dc   :  { %v1239_v26 = vpop.f32.mrf.mxu0  ;;  %1295 = vadd.xlane.f32.xlu0 %v1294_v23 }
 0x9dd   :  { %v1283_v30 = vmul.f32 %v1572_v38, %v1255_v16  ;;  %v1244_v22 = vmul.f32 %v1239_v26, %v1070_v57  ;;  %v1291_v47 = vmul.f32 0.5, %v1287_v25 }
 0x9de   :  { %v1512_v32 = vpop.f32.mrf.mxu0 }
 0x9df   :  { %v1256_v49 = vadd.f32 %v1252_v15, %v1244_v22  ;;  %v1297_v33 = vsel %vm114_vm1, %v1291_v47, 0.0  ;;  %v1288_v52 = vadd.f32 %v1283_v30, %v792_v21 }
 0x9e0   :  { %1298 = vadd.xlane.f32.xlu1 %v1297_v33 }
 0x9e1   :  { %v1285_v53 = vmul.f32 %v1574_v40, %v1256_v49  ;;  %v1292_v31 = vmul.f32 0.5, %v1288_v52 }
 0x9e3   :  { %v1300_v10 = vsel %vm114_vm1, %v1292_v31, 0.0  ;;  %v1289_v18 = vadd.f32 %v1285_v53, %v793_v20 }
 0x9e4   :  { %1301 = vadd.xlane.f32.xlu0 %v1300_v10 }
 0x9e5   :  { %v1293_v54 = vmul.f32 0.5, %v1289_v18 }
 0x9e7   :  { %v1303_v55 = vsel %vm114_vm1, %v1293_v54, 0.0 }
 0x9e8   :  { %1304 = vadd.xlane.f32.xlu0 %v1303_v55 }
 0xa65   :  { %v1296_v36 = vpop.xlane.xlu0 %1295 }
 0xa66   :  { %v1306_v50 = vmul.f32 0.03125, %v1296_v36 }
 0xa68   :  { %v1310_v44 = vsub.f32 %v1290_v28, %v1306_v50 }
 0xa69   :  { %v1299_v24 = vpop.xlane.xlu1 %1298 }
 0xa6a   :  { %v1307_v14 = vmul.f32 0.03125, %v1299_v24  ;;  %v1314_v21 = vmul.f32 %v1310_v44, %v1310_v44 }
 0xa6c   :  { %v1311_v46 = vsub.f32 %v1291_v47, %v1307_v14  ;;  %v1318_v34 = vsel %vm114_vm1, %v1314_v21, 0.0 }
 0xa6d   :  { %1319 = vadd.xlane.f32.xlu0 %v1318_v34  ;;  %v1302_v35 = vpop.xlane.xlu0 %1301 }
 0xa6e   :  { %v1308_v56 = vmul.f32 0.03125, %v1302_v35  ;;  %v1315_v48 = vmul.f32 %v1311_v46, %v1311_v46 }
 0xa70   :  { %v1312_v19 = vsub.f32 %v1292_v31, %v1308_v56  ;;  %v1321_v20 = vsel %vm114_vm1, %v1315_v48, 0.0 }
 0xa71   :  { %1322 = vadd.xlane.f32.xlu1 %v1321_v20  ;;  %v1305_v57 = vpop.xlane.xlu0 %1304 }
 0xa72   :  { %v1309_v51 = vmul.f32 0.03125, %v1305_v57  ;;  %v1316_v58 = vmul.f32 %v1312_v19, %v1312_v19 }
 0xa74   :  { %v1313_v59 = vsub.f32 %v1293_v54, %v1309_v51  ;;  %v1324_v29 = vsel %vm114_vm1, %v1316_v58, 0.0 }
 0xa75   :  { %1325 = vadd.xlane.f32.xlu0 %v1324_v29 }
 0xa76   :  { %v1317_v60 = vmul.f32 %v1313_v59, %v1313_v59 }
 0xa78   :  { %v1327_v62 = vsel %vm114_vm1, %v1317_v60, 0.0 }
 0xa79   :  { %1328 = vadd.xlane.f32.xlu1 %v1327_v62 }
 0xaf6   :  { %v1320_v39 = vpop.xlane.xlu0 %1319 }
 0xaf7   :  { %v1330_v63 = vmul.f32 0.03125, %v1320_v39 }
 0xaf9   :  { %v1334_v41 = vadd.f32 1e-05, %v1330_v63 }
 0xafa   :  { %v1323_v1 = vpop.xlane.xlu1 %1322 }
 0xafb   :  { %1575 = vrsqrt.f32 %v1334_v41  ;;  %v1331_v2 = vmul.f32 0.03125, %v1323_v1 }
 0xafd   :  { %v1335_v4 = vadd.f32 1e-05, %v1331_v2 }
 0xafe   :  { %v1326_v5 = vpop.xlane.xlu0 %1325 }
 0xaff   :  { %1577 = vrsqrt.f32 %v1335_v4  ;;  %v1332_v6 = vmul.f32 0.03125, %v1326_v5 }
 0xb01   :  { %v1336_v45 = vadd.f32 1e-05, %v1332_v6 }
 0xb02   :  { %v1329_v7 = vpop.xlane.xlu1 %1328 }
 0xb03   :  { %1579 = vrsqrt.f32 %v1336_v45  ;;  %v1333_v17 = vmul.f32 0.03125, %v1329_v7 }
 0xb05   :  { %v1337_v8 = vadd.f32 1e-05, %v1333_v17 }
 0xb07   :  { %1581 = vrsqrt.f32 %v1337_v8 }
 0xb08   :  { %v1576_v37 = vpop.eup %1575 }
 0xb09   :  { %v1342_v11 = vmul.f32 %v1576_v37, %v1310_v44 }
 0xb0b   :  { %v1350_v13 = vmul.f32 %v1349_v9, %v1342_v11 }
 0xb0c   :  { %v1578_v27 = vpop.eup %1577 }
 0xb0d   :  { %v1358_v28 = vadd.f32 %v1357_v0, %v1350_v13  ;;  %v1343_v61 = vmul.f32 %v1578_v27, %v1311_v46 }
 0xb0f   :  { %v1362_v3 = vmax.f32 %v1358_v28, 0.0  ;;  %v1351_v16 = vmul.f32 %v1349_v9, %v1343_v61 }
 0xb10   :  { %v1580_v23 = vpop.eup %1579 }
 0xb11   :  { %1366 = vst.msk [vmem:[%s2040_s7] sm:$0xff] %vm114_vm1, %v1362_v3  ;;  %v1359_v25 = vadd.f32 %v1357_v0, %v1351_v16  ;;  %v1344_v38 = vmul.f32 %v1580_v23, %v1312_v19 }
 0xb13   :  { %v1363_v26 = vmax.f32 %v1359_v25, 0.0  ;;  %v1352_v30 = vmul.f32 %v1349_v9, %v1344_v38 }
 0xb14   :  { %v1582_v22 = vpop.eup %1581 }
 0xb15   :  { %1367 = vst.msk [vmem:[%s2040_s7 + $0x8] sm:$0xff] %vm114_vm1, %v1363_v26  ;;  %v1360_v47 = vadd.f32 %v1357_v0, %v1352_v30  ;;  %v1345_v15 = vmul.f32 %v1582_v22, %v1313_v59 }
 0xb17   :  { %v1364_v32 = vmax.f32 %v1360_v47, 0.0  ;;  %v1353_v49 = vmul.f32 %v1349_v9, %v1345_v15 }
 0xb19   :  { %1368 = vst.msk [vmem:[%s2040_s7 + $0x10] sm:$0xff] %vm114_vm1, %v1364_v32  ;;  %v1361_v33 = vadd.f32 %v1357_v0, %v1353_v49 }
 0xb1b   :  { %v1365_v52 = vmax.f32 %v1361_v33, 0.0 }
 0xb1d   :  { %1369 = vst.msk [vmem:[%s2040_s7 + $0x18] sm:$0xff] %vm114_vm1, %v1365_v52 }
 0xb1e   :  { %1374 = vsyncpa [#allocation3], 1 }

</bundles_post_ra>
